<compile_context>
chip_gen: v5e
topology: v5e:2x2
jax: 0.10.0
libtpu: 0.0.40
codegen_flags: <defaults>
</compile_context>

<pallas_src>
import functools

import jax
import jax.numpy as jnp
import numpy as np
from jax.experimental import pallas as pl
from jax.experimental.pallas import tpu as pltpu

EPS = 1e-5


def _round_up(x, m):
    return (x + m - 1) // m * m


def _instance_norm(y, maskb, inv_cnt, g, b):
    """Masked single-pass instance norm (biased variance, eps=1e-5).

    y: (C, Lc) f32 conv output; maskb: (1, Lc) bool, True on valid-pixel lanes.
    jnp.where (not multiply) keeps garbage in invalid lanes out of the stats.
    """
    ym = jnp.where(maskb, y, 0.0)
    mean = jnp.sum(ym, axis=1, keepdims=True) * inv_cnt
    ex2 = jnp.sum(jnp.where(maskb, y * y, 0.0), axis=1, keepdims=True) * inv_cnt
    var = jnp.maximum(ex2 - mean * mean, 0.0)
    return (y - mean) * (g * jax.lax.rsqrt(var + EPS)) + b


def _conv3x3(window, w_ref, c, stacked, stk_ref):
    """3x3 conv over the padded-column layout.

    window(t) -> (C, Lc) compute-dtype view of the padded slab shifted by tap t (t = ki*3+kj).
      * stacked: write the 9 windows into a (9C, Lc) scratch, ONE (C, 9C)@(9C, Lc) MXU dot.
      * per-tap: 9 (C, C)@(C, Lc) dots accumulated in f32 registers (best for tiny C);
        weights are (9, C, C) so w_ref[t] is an aligned leading-axis view.
    """
    if stacked:
        for t in range(9):
            stk_ref[t * c:(t + 1) * c, :] = window(t)
        return jnp.dot(w_ref[...], stk_ref[...], preferred_element_type=jnp.float32)
    acc = None
    for t in range(9):
        part = jnp.dot(w_ref[t], window(t), preferred_element_type=jnp.float32)
        acc = part if acc is None else acc + part
    return acc


def _resblock_kernel(x_ref, m_ref, w1_ref, g1_ref, b1_ref, w2_ref, g2_ref, b2_ref,
                     o_ref, xpad_ref, hpad_ref, *stk,
                     h, w, wp, lc, off, inv_cnt, cdtype, stacked):
    # x_ref   : (C, H*W)  dense f32 input (only HBM read of x; residual stays f32)
    # m_ref   : (1, Lc)   1.0 on valid output-pixel lanes of the padded-column domain
    # w*_ref  : (9, C, C) per-tap layout  OR  (C, 9C) tap-major (stacked path), compute dtype
    # g*/b*   : (C, 1) f32 affine params
    # o_ref   : (C, H*W)  dense f32 output
    # xpad_ref: (C, Lin)  compute-dtype scratch: zero-padded input, padded-column layout
    # hpad_ref: (C, Lh)   compute-dtype scratch: zero-padded intermediate activation
    # stk     : optional (9C, Lc) compute-dtype scratch for the single K=9C dot
    c = g1_ref.shape[0]
    stk_ref = stk[0] if stacked else None
    maskb = m_ref[...] != 0.0

    # ---- build the zero-padded input slab in VMEM, cast to compute dtype ONCE ----
    # (zero fill provides every padding column/row; rows are copied in from the dense block)
    xpad_ref[...] = jnp.zeros_like(xpad_ref)
    for i in range(h):
        xpad_ref[:, (i + 1) * wp + 1:(i + 1) * wp + 1 + w] = (
            x_ref[:, i * w:(i + 1) * w].astype(cdtype))

    # ---- conv1 (3x3, pad=1, no bias) + IN1 + ReLU ----
    acc1 = _conv3x3(
        lambda t: xpad_ref[:, (t // 3) * wp + (t % 3):(t // 3) * wp + (t % 3) + lc],
        w1_ref, c, stacked, stk_ref)
    a1 = _instance_norm(acc1, maskb, inv_cnt, g1_ref[...], b1_ref[...])
    a1 = jnp.where(maskb, jnp.maximum(a1, 0.0), 0.0)   # ReLU + zero the padding lanes

    # stash padded intermediate in compute dtype; only the 128-aligned halos need zeroing
    # (intra-row pad lanes are already zero via the mask; the interior is overwritten)
    hpad_ref[:, :off] = jnp.zeros((c, off), cdtype)
    hpad_ref[:, off + lc:] = jnp.zeros((c, hpad_ref.shape[1] - off - lc), cdtype)
    hpad_ref[:, off:off + lc] = a1.astype(cdtype)

    # ---- conv2 + IN2 ----
    base = off - (wp + 1)
    acc2 = _conv3x3(
        lambda t: hpad_ref[:, base + (t // 3) * wp + (t % 3):
                           base + (t // 3) * wp + (t % 3) + lc],
        w2_ref, c, stacked, stk_ref)
    y = _instance_norm(acc2, maskb, inv_cnt, g2_ref[...], b2_ref[...])

    # ---- residual add (f32 x) + write the DENSE layout (no wrapper re-slice pass) ----
    for i in range(h):
        o_ref[:, i * w:(i + 1) * w] = (
            y[:, i * wp:i * wp + w] + x_ref[:, i * w:(i + 1) * w]).astype(o_ref.dtype)


def _prep_weights(wt, c, stacked, dtype):
    wf = wt.astype(jnp.float32)
    if stacked:
        # (Cout, Cin, 3, 3) -> (Cout, 9*Cin); column block t=ki*3+kj holds w[:, :, ki, kj]
        return jnp.transpose(wf, (0, 2, 3, 1)).reshape(c, 9 * c).astype(dtype)
    # (Cout, Cin, 3, 3) -> (9, Cout, Cin); leading tap axis -> aligned per-tap views
    return jnp.transpose(wf, (2, 3, 0, 1)).reshape(9, c, c).astype(dtype)


@functools.partial(jax.jit, static_argnames=("compute_dtype",))
def residual_block(x, w1, g1, b1, w2, g2, b2, *, compute_dtype=jnp.bfloat16):
    """x: (N, C, H, W) f32; w*: (C, C, 3, 3); g*/b*: (C,). Returns (N, C, H, W) f32."""
    N, C, H, W = x.shape
    Wp = W + 2
    HW = H * W
    Lo = H * Wp                                # padded-column compute domain length
    Lc = _round_up(Lo, 128)                    # lane-dense compute length
    Lin = _round_up(Lc + 2 * Wp + 3, 128)      # padded-input scratch length
    OFF = _round_up(Wp + 1, 128)               # 128-aligned placement of the intermediate
    Lh = _round_up(OFF + Lc + Wp + 1, 128)     # padded-intermediate scratch length
    stacked = C >= 16                          # single K=9C dot vs per-tap register-acc dots

    x = x.astype(jnp.float32)
    xd = x.reshape(N, C, HW)                   # dense view; NO padded HBM copy of x
    w1t = _prep_weights(w1, C, stacked, compute_dtype)
    w2t = _prep_weights(w2, C, stacked, compute_dtype)
    g1c = g1.astype(jnp.float32).reshape(C, 1)
    b1c = b1.astype(jnp.float32).reshape(C, 1)
    g2c = g2.astype(jnp.float32).reshape(C, 1)
    b2c = b2.astype(jnp.float32).reshape(C, 1)

    # valid-lane mask of the padded-column domain (host-built; no in-kernel div/mod)
    p = np.arange(Lc)
    mask = jnp.asarray(((p % Wp) < W) & (p < Lo), jnp.float32).reshape(1, Lc)

    kernel = functools.partial(_resblock_kernel, h=H, w=W, wp=Wp, lc=Lc, off=OFF,
                               inv_cnt=1.0 / float(HW), cdtype=compute_dtype,
                               stacked=stacked)

    wd = jnp.dtype(compute_dtype).itemsize
    scratch_shapes = [pltpu.VMEM((C, Lin), compute_dtype),
                      pltpu.VMEM((C, Lh), compute_dtype)]
    if stacked:
        scratch_shapes.append(pltpu.VMEM((9 * C, Lc), compute_dtype))

    # VMEM budget: 2x double-buffered in/out blocks + 1x scratch + f32-temp margin,
    # capped below the physical VMEM of the current generation (v7x: 64 MiB/TC).
    in_bytes = 4 * (C * HW + Lc + 4 * C) + 2 * wd * 9 * C * C
    out_bytes = 4 * C * HW
    scr_bytes = wd * (C * Lin + C * Lh + (9 * C * Lc if stacked else 0))
    need = 2 * (in_bytes + out_bytes) + scr_bytes + 3 * 4 * C * Lc + (2 << 20)
    try:
        cap = int(pltpu.get_tpu_info().vmem_capacity_bytes * 0.85)
    except Exception:
        cap = 48 * 2 ** 20
    vmem_limit = int(min(max(need, 16 * 2 ** 20), cap))

    out = pl.pallas_call(
        kernel,
        out_shape=jax.ShapeDtypeStruct((N, C, HW), jnp.float32),
        grid_spec=pltpu.PrefetchScalarGridSpec(
            num_scalar_prefetch=0,
            grid=(N,),
            in_specs=[
                pl.BlockSpec((None, C, HW), lambda n: (n, 0, 0)),      # dense x (f32)
                pl.BlockSpec((1, Lc), lambda n: (0, 0)),               # valid-lane mask
                pl.BlockSpec(w1t.shape, lambda n: (0,) * w1t.ndim),    # conv1 weights
                pl.BlockSpec((C, 1), lambda n: (0, 0)),                # gamma1
                pl.BlockSpec((C, 1), lambda n: (0, 0)),                # beta1
                pl.BlockSpec(w2t.shape, lambda n: (0,) * w2t.ndim),    # conv2 weights
                pl.BlockSpec((C, 1), lambda n: (0, 0)),                # gamma2
                pl.BlockSpec((C, 1), lambda n: (0, 0)),                # beta2
            ],
            out_specs=pl.BlockSpec((None, C, HW), lambda n: (n, 0, 0)),
            scratch_shapes=scratch_shapes,
        ),
        compiler_params=pltpu.CompilerParams(
            dimension_semantics=("parallel",),
            vmem_limit_bytes=vmem_limit),
    )(xd, mask, w1t, g1c, b1c, w2t, g2c, b2c)

    return out.reshape(N, C, H, W)


# ----------------------------- pure-JAX reference ---------------------------------------
def _conv_nchw(a, wt, conv_dtype=None):
    if conv_dtype is not None:
        a = a.astype(conv_dtype)
        wt = wt.astype(conv_dtype)
    return jax.lax.conv_general_dilated(
        a, wt, window_strides=(1, 1), padding="SAME",
        dimension_numbers=("NCHW", "OIHW", "NCHW"),
        preferred_element_type=jnp.float32)


def _reference(x, w1, g1, b1, w2, g2, b2, conv_dtype=None):
    def inorm(a, g, b):
        m = a.mean(axis=(2, 3), keepdims=True)
        v = jnp.mean(jnp.square(a - m), axis=(2, 3), keepdims=True)
        return (g[None, :, None, None] * (a - m) * jax.lax.rsqrt(v + EPS)
                + b[None, :, None, None])

    h = jax.nn.relu(inorm(_conv_nchw(x, w1, conv_dtype), g1, b1))
    return inorm(_conv_nchw(h, w2, conv_dtype), g2, b2) + x


def _make_inputs(key, N, C, H, W):
    kx, k1, k2, kg1, kb1, kg2, kb2 = jax.random.split(key, 7)
    x = jax.random.normal(kx, (N, C, H, W), dtype=jnp.float32)
    w1 = 0.2 * jax.random.normal(k1, (C, C, 3, 3), dtype=jnp.float32)
    w2 = 0.2 * jax.random.normal(k2, (C, C, 3, 3), dtype=jnp.float32)
    g1 = 1.0 + 0.1 * jax.random.normal(kg1, (C,), dtype=jnp.float32)
    b1 = 0.1 * jax.random.normal(kb1, (C,), dtype=jnp.float32)
    g2 = 1.0 + 0.1 * jax.random.normal(kg2, (C,), dtype=jnp.float32)
    b2 = 0.1 * jax.random.normal(kb2, (C,), dtype=jnp.float32)
    return x, w1, g1, b1, w2, g2, b2


if __name__ == "__main__":
    key = jax.random.PRNGKey(0)
    k_a, k_b = jax.random.split(key)

    # ---- Test 1: small C (per-tap dot path), N=2, C=4, 16x16 ----
    args = _make_inputs(k_a, 2, 4, 16, 16)

    # exact-semantics check: f32 MXU operands vs f32 XLA reference
    out_f32 = jax.block_until_ready(residual_block(*args, compute_dtype=jnp.float32))
    ref_f32 = jax.block_until_ready(_reference(*args))
    assert out_f32.shape == (2, 4, 16, 16)
    np.testing.assert_allclose(np.asarray(out_f32), np.asarray(ref_f32),
                               rtol=1e-4, atol=1e-4)

    # optimized default: bf16 MXU operands + f32 accumulation vs bf16-conv XLA reference
    out_bf16 = jax.block_until_ready(residual_block(*args, compute_dtype=jnp.bfloat16))
    ref_bf16 = jax.block_until_ready(_reference(*args, conv_dtype=jnp.bfloat16))
    np.testing.assert_allclose(np.asarray(out_bf16), np.asarray(ref_bf16),
                               rtol=2e-2, atol=2e-2)

    # ---- Test 2: C>=16 (stacked single K=9C dot path), N=1, C=32, 12x12 ----
    args2 = _make_inputs(k_b, 1, 32, 12, 12)
    out2 = jax.block_until_ready(residual_block(*args2, compute_dtype=jnp.bfloat16))
    ref2 = jax.block_until_ready(_reference(*args2, conv_dtype=jnp.bfloat16))
    assert out2.shape == (1, 32, 12, 12)
    np.testing.assert_allclose(np.asarray(out2), np.asarray(ref2),
                               rtol=2e-2, atol=2e-2)

    print("KERNEL_OK")
</pallas_src>

<mosaic_0001>
module attributes {stable_mosaic.version = 11 : i64} {
  func.func @_resblock_kernel(%arg0: i32, %arg1: memref<1x4x256xf32, #tpu.memory_space<vmem>>, %arg2: memref<1x384xf32, #tpu.memory_space<vmem>>, %arg3: memref<9x4x4xf32, #tpu.memory_space<vmem>>, %arg4: memref<4x1xf32, #tpu.memory_space<vmem>>, %arg5: memref<4x1xf32, #tpu.memory_space<vmem>>, %arg6: memref<9x4x4xf32, #tpu.memory_space<vmem>>, %arg7: memref<4x1xf32, #tpu.memory_space<vmem>>, %arg8: memref<4x1xf32, #tpu.memory_space<vmem>>, %arg9: memref<1x4x256xf32, #tpu.memory_space<vmem>>, %arg10: memref<4x512xf32, #tpu.memory_space<vmem>>, %arg11: memref<4x640xf32, #tpu.memory_space<vmem>>) attributes {dimension_semantics = [#tpu.dimension_semantics<parallel>], iteration_bounds = array<i64: 2>, scalar_prefetch = 0 : i64, scratch_operands = 2 : i64, tpu.core_type = #tpu.core_type<tc>, window_params = [{transform_indices = @transform_0, window_bounds = array<i64: 1, 4, 256>}, {pipeline_mode = #tpu.pipeline_mode<synchronous>, transform_indices = @transform_1, window_bounds = array<i64: 1, 384>}, {pipeline_mode = #tpu.pipeline_mode<synchronous>, transform_indices = @transform_2, window_bounds = array<i64: 9, 4, 4>}, {pipeline_mode = #tpu.pipeline_mode<synchronous>, transform_indices = @transform_3, window_bounds = array<i64: 4, 1>}, {pipeline_mode = #tpu.pipeline_mode<synchronous>, transform_indices = @transform_4, window_bounds = array<i64: 4, 1>}, {pipeline_mode = #tpu.pipeline_mode<synchronous>, transform_indices = @transform_5, window_bounds = array<i64: 9, 4, 4>}, {pipeline_mode = #tpu.pipeline_mode<synchronous>, transform_indices = @transform_6, window_bounds = array<i64: 4, 1>}, {pipeline_mode = #tpu.pipeline_mode<synchronous>, transform_indices = @transform_7, window_bounds = array<i64: 4, 1>}, {transform_indices = @transform_8, window_bounds = array<i64: 1, 4, 256>}]} {
    %c0 = arith.constant 0 : index
    %c0_0 = arith.constant 0 : index
    %0 = vector.load %arg2[%c0, %c0_0] : memref<1x384xf32, #tpu.memory_space<vmem>>, vector<1x384xf32>
    %cst = arith.constant 0.000000e+00 : f32
    %1 = vector.broadcast %cst : f32 to vector<1x384xf32>
    %2 = arith.cmpf one, %0, %1 : vector<1x384xf32>
    %cst_1 = arith.constant 0.000000e+00 : f32
    %3 = vector.broadcast %cst_1 : f32 to vector<4x512xf32>
    %c0_2 = arith.constant 0 : index
    %c0_3 = arith.constant 0 : index
    %4 = vector.load %arg10[%c0_2, %c0_3] : memref<4x512xf32, #tpu.memory_space<vmem>>, vector<4x512xf32>
    tpu.vector_store %arg10[%c0_2, %c0_3], %3 {strides = array<i32>} : memref<4x512xf32, #tpu.memory_space<vmem>>, vector<4x512xf32>,
    %c0_4 = arith.constant 0 : index
    %c0_5 = arith.constant 0 : index
    %c0_6 = arith.constant 0 : index
    %5 = vector.load %arg1[%c0_4, %c0_5, %c0_6] : memref<1x4x256xf32, #tpu.memory_space<vmem>>, vector<1x4x16xf32>
    %6 = vector.shape_cast %5 : vector<1x4x16xf32> to vector<4x16xf32>
    %c0_7 = arith.constant 0 : index
    %c19 = arith.constant 19 : index
    %7 = vector.load %arg10[%c0_7, %c19] : memref<4x512xf32, #tpu.memory_space<vmem>>, vector<4x16xf32>
    tpu.vector_store %arg10[%c0_7, %c19], %6 {strides = array<i32>} : memref<4x512xf32, #tpu.memory_space<vmem>>, vector<4x16xf32>,
    %c0_8 = arith.constant 0 : index
    %c0_9 = arith.constant 0 : index
    %c16 = arith.constant 16 : index
    %8 = vector.load %arg1[%c0_8, %c0_9, %c16] : memref<1x4x256xf32, #tpu.memory_space<vmem>>, vector<1x4x16xf32>
    %9 = vector.shape_cast %8 : vector<1x4x16xf32> to vector<4x16xf32>
    %c0_10 = arith.constant 0 : index
    %c37 = arith.constant 37 : index
    %10 = vector.load %arg10[%c0_10, %c37] : memref<4x512xf32, #tpu.memory_space<vmem>>, vector<4x16xf32>
    tpu.vector_store %arg10[%c0_10, %c37], %9 {strides = array<i32>} : memref<4x512xf32, #tpu.memory_space<vmem>>, vector<4x16xf32>,
    %c0_11 = arith.constant 0 : index
    %c0_12 = arith.constant 0 : index
    %c32 = arith.constant 32 : index
    %11 = vector.load %arg1[%c0_11, %c0_12, %c32] : memref<1x4x256xf32, #tpu.memory_space<vmem>>, vector<1x4x16xf32>
    %12 = vector.shape_cast %11 : vector<1x4x16xf32> to vector<4x16xf32>
    %c0_13 = arith.constant 0 : index
    %c55 = arith.constant 55 : index
    %13 = vector.load %arg10[%c0_13, %c55] : memref<4x512xf32, #tpu.memory_space<vmem>>, vector<4x16xf32>
    tpu.vector_store %arg10[%c0_13, %c55], %12 {strides = array<i32>} : memref<4x512xf32, #tpu.memory_space<vmem>>, vector<4x16xf32>,
    %c0_14 = arith.constant 0 : index
    %c0_15 = arith.constant 0 : index
    %c48 = arith.constant 48 : index
    %14 = vector.load %arg1[%c0_14, %c0_15, %c48] : memref<1x4x256xf32, #tpu.memory_space<vmem>>, vector<1x4x16xf32>
    %15 = vector.shape_cast %14 : vector<1x4x16xf32> to vector<4x16xf32>
    %c0_16 = arith.constant 0 : index
    %c73 = arith.constant 73 : index
    %16 = vector.load %arg10[%c0_16, %c73] : memref<4x512xf32, #tpu.memory_space<vmem>>, vector<4x16xf32>
    tpu.vector_store %arg10[%c0_16, %c73], %15 {strides = array<i32>} : memref<4x512xf32, #tpu.memory_space<vmem>>, vector<4x16xf32>,
    %c0_17 = arith.constant 0 : index
    %c0_18 = arith.constant 0 : index
    %c64 = arith.constant 64 : index
    %17 = vector.load %arg1[%c0_17, %c0_18, %c64] : memref<1x4x256xf32, #tpu.memory_space<vmem>>, vector<1x4x16xf32>
    %18 = vector.shape_cast %17 : vector<1x4x16xf32> to vector<4x16xf32>
    %c0_19 = arith.constant 0 : index
    %c91 = arith.constant 91 : index
    %19 = vector.load %arg10[%c0_19, %c91] : memref<4x512xf32, #tpu.memory_space<vmem>>, vector<4x16xf32>
    tpu.vector_store %arg10[%c0_19, %c91], %18 {strides = array<i32>} : memref<4x512xf32, #tpu.memory_space<vmem>>, vector<4x16xf32>,
    %c0_20 = arith.constant 0 : index
    %c0_21 = arith.constant 0 : index
    %c80 = arith.constant 80 : index
    %20 = vector.load %arg1[%c0_20, %c0_21, %c80] : memref<1x4x256xf32, #tpu.memory_space<vmem>>, vector<1x4x16xf32>
    %21 = vector.shape_cast %20 : vector<1x4x16xf32> to vector<4x16xf32>
    %c0_22 = arith.constant 0 : index
    %c109 = arith.constant 109 : index
    %22 = vector.load %arg10[%c0_22, %c109] : memref<4x512xf32, #tpu.memory_space<vmem>>, vector<4x16xf32>
    tpu.vector_store %arg10[%c0_22, %c109], %21 {strides = array<i32>} : memref<4x512xf32, #tpu.memory_space<vmem>>, vector<4x16xf32>,
    %c0_23 = arith.constant 0 : index
    %c0_24 = arith.constant 0 : index
    %c96 = arith.constant 96 : index
    %23 = vector.load %arg1[%c0_23, %c0_24, %c96] : memref<1x4x256xf32, #tpu.memory_space<vmem>>, vector<1x4x16xf32>
    %24 = vector.shape_cast %23 : vector<1x4x16xf32> to vector<4x16xf32>
    %c0_25 = arith.constant 0 : index
    %c127 = arith.constant 127 : index
    %25 = vector.load %arg10[%c0_25, %c127] : memref<4x512xf32, #tpu.memory_space<vmem>>, vector<4x16xf32>
    tpu.vector_store %arg10[%c0_25, %c127], %24 {strides = array<i32>} : memref<4x512xf32, #tpu.memory_space<vmem>>, vector<4x16xf32>,
    %c0_26 = arith.constant 0 : index
    %c0_27 = arith.constant 0 : index
    %c112 = arith.constant 112 : index
    %26 = vector.load %arg1[%c0_26, %c0_27, %c112] : memref<1x4x256xf32, #tpu.memory_space<vmem>>, vector<1x4x16xf32>
    %27 = vector.shape_cast %26 : vector<1x4x16xf32> to vector<4x16xf32>
    %c0_28 = arith.constant 0 : index
    %c145 = arith.constant 145 : index
    %28 = vector.load %arg10[%c0_28, %c145] : memref<4x512xf32, #tpu.memory_space<vmem>>, vector<4x16xf32>
    tpu.vector_store %arg10[%c0_28, %c145], %27 {strides = array<i32>} : memref<4x512xf32, #tpu.memory_space<vmem>>, vector<4x16xf32>,
    %c0_29 = arith.constant 0 : index
    %c0_30 = arith.constant 0 : index
    %c128 = arith.constant 128 : index
    %29 = vector.load %arg1[%c0_29, %c0_30, %c128] : memref<1x4x256xf32, #tpu.memory_space<vmem>>, vector<1x4x16xf32>
    %30 = vector.shape_cast %29 : vector<1x4x16xf32> to vector<4x16xf32>
    %c0_31 = arith.constant 0 : index
    %c163 = arith.constant 163 : index
    %31 = vector.load %arg10[%c0_31, %c163] : memref<4x512xf32, #tpu.memory_space<vmem>>, vector<4x16xf32>
    tpu.vector_store %arg10[%c0_31, %c163], %30 {strides = array<i32>} : memref<4x512xf32, #tpu.memory_space<vmem>>, vector<4x16xf32>,
    %c0_32 = arith.constant 0 : index
    %c0_33 = arith.constant 0 : index
    %c144 = arith.constant 144 : index
    %32 = vector.load %arg1[%c0_32, %c0_33, %c144] : memref<1x4x256xf32, #tpu.memory_space<vmem>>, vector<1x4x16xf32>
    %33 = vector.shape_cast %32 : vector<1x4x16xf32> to vector<4x16xf32>
    %c0_34 = arith.constant 0 : index
    %c181 = arith.constant 181 : index
    %34 = vector.load %arg10[%c0_34, %c181] : memref<4x512xf32, #tpu.memory_space<vmem>>, vector<4x16xf32>
    tpu.vector_store %arg10[%c0_34, %c181], %33 {strides = array<i32>} : memref<4x512xf32, #tpu.memory_space<vmem>>, vector<4x16xf32>,
    %c0_35 = arith.constant 0 : index
    %c0_36 = arith.constant 0 : index
    %c160 = arith.constant 160 : index
    %35 = vector.load %arg1[%c0_35, %c0_36, %c160] : memref<1x4x256xf32, #tpu.memory_space<vmem>>, vector<1x4x16xf32>
    %36 = vector.shape_cast %35 : vector<1x4x16xf32> to vector<4x16xf32>
    %c0_37 = arith.constant 0 : index
    %c199 = arith.constant 199 : index
    %37 = vector.load %arg10[%c0_37, %c199] : memref<4x512xf32, #tpu.memory_space<vmem>>, vector<4x16xf32>
    tpu.vector_store %arg10[%c0_37, %c199], %36 {strides = array<i32>} : memref<4x512xf32, #tpu.memory_space<vmem>>, vector<4x16xf32>,
    %c0_38 = arith.constant 0 : index
    %c0_39 = arith.constant 0 : index
    %c176 = arith.constant 176 : index
    %38 = vector.load %arg1[%c0_38, %c0_39, %c176] : memref<1x4x256xf32, #tpu.memory_space<vmem>>, vector<1x4x16xf32>
    %39 = vector.shape_cast %38 : vector<1x4x16xf32> to vector<4x16xf32>
    %c0_40 = arith.constant 0 : index
    %c217 = arith.constant 217 : index
    %40 = vector.load %arg10[%c0_40, %c217] : memref<4x512xf32, #tpu.memory_space<vmem>>, vector<4x16xf32>
    tpu.vector_store %arg10[%c0_40, %c217], %39 {strides = array<i32>} : memref<4x512xf32, #tpu.memory_space<vmem>>, vector<4x16xf32>,
    %c0_41 = arith.constant 0 : index
    %c0_42 = arith.constant 0 : index
    %c192 = arith.constant 192 : index
    %41 = vector.load %arg1[%c0_41, %c0_42, %c192] : memref<1x4x256xf32, #tpu.memory_space<vmem>>, vector<1x4x16xf32>
    %42 = vector.shape_cast %41 : vector<1x4x16xf32> to vector<4x16xf32>
    %c0_43 = arith.constant 0 : index
    %c235 = arith.constant 235 : index
    %43 = vector.load %arg10[%c0_43, %c235] : memref<4x512xf32, #tpu.memory_space<vmem>>, vector<4x16xf32>
    tpu.vector_store %arg10[%c0_43, %c235], %42 {strides = array<i32>} : memref<4x512xf32, #tpu.memory_space<vmem>>, vector<4x16xf32>,
    %c0_44 = arith.constant 0 : index
    %c0_45 = arith.constant 0 : index
    %c208 = arith.constant 208 : index
    %44 = vector.load %arg1[%c0_44, %c0_45, %c208] : memref<1x4x256xf32, #tpu.memory_space<vmem>>, vector<1x4x16xf32>
    %45 = vector.shape_cast %44 : vector<1x4x16xf32> to vector<4x16xf32>
    %c0_46 = arith.constant 0 : index
    %c253 = arith.constant 253 : index
    %46 = vector.load %arg10[%c0_46, %c253] : memref<4x512xf32, #tpu.memory_space<vmem>>, vector<4x16xf32>
    tpu.vector_store %arg10[%c0_46, %c253], %45 {strides = array<i32>} : memref<4x512xf32, #tpu.memory_space<vmem>>, vector<4x16xf32>,
    %c0_47 = arith.constant 0 : index
    %c0_48 = arith.constant 0 : index
    %c224 = arith.constant 224 : index
    %47 = vector.load %arg1[%c0_47, %c0_48, %c224] : memref<1x4x256xf32, #tpu.memory_space<vmem>>, vector<1x4x16xf32>
    %48 = vector.shape_cast %47 : vector<1x4x16xf32> to vector<4x16xf32>
    %c0_49 = arith.constant 0 : index
    %c271 = arith.constant 271 : index
    %49 = vector.load %arg10[%c0_49, %c271] : memref<4x512xf32, #tpu.memory_space<vmem>>, vector<4x16xf32>
    tpu.vector_store %arg10[%c0_49, %c271], %48 {strides = array<i32>} : memref<4x512xf32, #tpu.memory_space<vmem>>, vector<4x16xf32>,
    %c0_50 = arith.constant 0 : index
    %c0_51 = arith.constant 0 : index
    %c240 = arith.constant 240 : index
    %50 = vector.load %arg1[%c0_50, %c0_51, %c240] : memref<1x4x256xf32, #tpu.memory_space<vmem>>, vector<1x4x16xf32>
    %51 = vector.shape_cast %50 : vector<1x4x16xf32> to vector<4x16xf32>
    %c0_52 = arith.constant 0 : index
    %c289 = arith.constant 289 : index
    %52 = vector.load %arg10[%c0_52, %c289] : memref<4x512xf32, #tpu.memory_space<vmem>>, vector<4x16xf32>
    tpu.vector_store %arg10[%c0_52, %c289], %51 {strides = array<i32>} : memref<4x512xf32, #tpu.memory_space<vmem>>, vector<4x16xf32>,
    %c0_53 = arith.constant 0 : index
    %c0_54 = arith.constant 0 : index
    %c0_55 = arith.constant 0 : index
    %53 = vector.load %arg3[%c0_53, %c0_54, %c0_55] : memref<9x4x4xf32, #tpu.memory_space<vmem>>, vector<1x4x4xf32>
    %54 = vector.shape_cast %53 : vector<1x4x4xf32> to vector<4x4xf32>
    %c0_56 = arith.constant 0 : index
    %c0_57 = arith.constant 0 : index
    %55 = vector.load %arg10[%c0_56, %c0_57] : memref<4x512xf32, #tpu.memory_space<vmem>>, vector<4x384xf32>
    %cst_58 = arith.constant dense<0.000000e+00> : vector<4x384xf32>
    %56 = tpu.matmul %54, %55, %cst_58 {dimension_numbers = #tpu.dot_dimension_numbers<[1], [0], [0], [1], [0, 0, 1, 1], [], []>} : vector<4x4xf32>, vector<4x384xf32>, vector<4x384xf32> -> vector<4x384xf32>
    %c1 = arith.constant 1 : index
    %c0_59 = arith.constant 0 : index
    %c0_60 = arith.constant 0 : index
    %57 = vector.load %arg3[%c1, %c0_59, %c0_60] : memref<9x4x4xf32, #tpu.memory_space<vmem>>, vector<1x4x4xf32>
    %58 = vector.shape_cast %57 : vector<1x4x4xf32> to vector<4x4xf32>
    %c0_61 = arith.constant 0 : index
    %c1_62 = arith.constant 1 : index
    %59 = vector.load %arg10[%c0_61, %c1_62] : memref<4x512xf32, #tpu.memory_space<vmem>>, vector<4x384xf32>
    %cst_63 = arith.constant dense<0.000000e+00> : vector<4x384xf32>
    %60 = tpu.matmul %58, %59, %cst_63 {dimension_numbers = #tpu.dot_dimension_numbers<[1], [0], [0], [1], [0, 0, 1, 1], [], []>} : vector<4x4xf32>, vector<4x384xf32>, vector<4x384xf32> -> vector<4x384xf32>
    %61 = arith.addf %56, %60 : vector<4x384xf32>
    %c2 = arith.constant 2 : index
    %c0_64 = arith.constant 0 : index
    %c0_65 = arith.constant 0 : index
    %62 = vector.load %arg3[%c2, %c0_64, %c0_65] : memref<9x4x4xf32, #tpu.memory_space<vmem>>, vector<1x4x4xf32>
    %63 = vector.shape_cast %62 : vector<1x4x4xf32> to vector<4x4xf32>
    %c0_66 = arith.constant 0 : index
    %c2_67 = arith.constant 2 : index
    %64 = vector.load %arg10[%c0_66, %c2_67] : memref<4x512xf32, #tpu.memory_space<vmem>>, vector<4x384xf32>
    %cst_68 = arith.constant dense<0.000000e+00> : vector<4x384xf32>
    %65 = tpu.matmul %63, %64, %cst_68 {dimension_numbers = #tpu.dot_dimension_numbers<[1], [0], [0], [1], [0, 0, 1, 1], [], []>} : vector<4x4xf32>, vector<4x384xf32>, vector<4x384xf32> -> vector<4x384xf32>
    %66 = arith.addf %61, %65 : vector<4x384xf32>
    %c3 = arith.constant 3 : index
    %c0_69 = arith.constant 0 : index
    %c0_70 = arith.constant 0 : index
    %67 = vector.load %arg3[%c3, %c0_69, %c0_70] : memref<9x4x4xf32, #tpu.memory_space<vmem>>, vector<1x4x4xf32>
    %68 = vector.shape_cast %67 : vector<1x4x4xf32> to vector<4x4xf32>
    %c0_71 = arith.constant 0 : index
    %c18 = arith.constant 18 : index
    %69 = vector.load %arg10[%c0_71, %c18] : memref<4x512xf32, #tpu.memory_space<vmem>>, vector<4x384xf32>
    %cst_72 = arith.constant dense<0.000000e+00> : vector<4x384xf32>
    %70 = tpu.matmul %68, %69, %cst_72 {dimension_numbers = #tpu.dot_dimension_numbers<[1], [0], [0], [1], [0, 0, 1, 1], [], []>} : vector<4x4xf32>, vector<4x384xf32>, vector<4x384xf32> -> vector<4x384xf32>
    %71 = arith.addf %66, %70 : vector<4x384xf32>
    %c4 = arith.constant 4 : index
    %c0_73 = arith.constant 0 : index
    %c0_74 = arith.constant 0 : index
    %72 = vector.load %arg3[%c4, %c0_73, %c0_74] : memref<9x4x4xf32, #tpu.memory_space<vmem>>, vector<1x4x4xf32>
    %73 = vector.shape_cast %72 : vector<1x4x4xf32> to vector<4x4xf32>
    %c0_75 = arith.constant 0 : index
    %c19_76 = arith.constant 19 : index
    %74 = vector.load %arg10[%c0_75, %c19_76] : memref<4x512xf32, #tpu.memory_space<vmem>>, vector<4x384xf32>
    %cst_77 = arith.constant dense<0.000000e+00> : vector<4x384xf32>
    %75 = tpu.matmul %73, %74, %cst_77 {dimension_numbers = #tpu.dot_dimension_numbers<[1], [0], [0], [1], [0, 0, 1, 1], [], []>} : vector<4x4xf32>, vector<4x384xf32>, vector<4x384xf32> -> vector<4x384xf32>
    %76 = arith.addf %71, %75 : vector<4x384xf32>
    %c5 = arith.constant 5 : index
    %c0_78 = arith.constant 0 : index
    %c0_79 = arith.constant 0 : index
    %77 = vector.load %arg3[%c5, %c0_78, %c0_79] : memref<9x4x4xf32, #tpu.memory_space<vmem>>, vector<1x4x4xf32>
    %78 = vector.shape_cast %77 : vector<1x4x4xf32> to vector<4x4xf32>
    %c0_80 = arith.constant 0 : index
    %c20 = arith.constant 20 : index
    %79 = vector.load %arg10[%c0_80, %c20] : memref<4x512xf32, #tpu.memory_space<vmem>>, vector<4x384xf32>
    %cst_81 = arith.constant dense<0.000000e+00> : vector<4x384xf32>
    %80 = tpu.matmul %78, %79, %cst_81 {dimension_numbers = #tpu.dot_dimension_numbers<[1], [0], [0], [1], [0, 0, 1, 1], [], []>} : vector<4x4xf32>, vector<4x384xf32>, vector<4x384xf32> -> vector<4x384xf32>
    %81 = arith.addf %76, %80 : vector<4x384xf32>
    %c6 = arith.constant 6 : index
    %c0_82 = arith.constant 0 : index
    %c0_83 = arith.constant 0 : index
    %82 = vector.load %arg3[%c6, %c0_82, %c0_83] : memref<9x4x4xf32, #tpu.memory_space<vmem>>, vector<1x4x4xf32>
    %83 = vector.shape_cast %82 : vector<1x4x4xf32> to vector<4x4xf32>
    %c0_84 = arith.constant 0 : index
    %c36 = arith.constant 36 : index
    %84 = vector.load %arg10[%c0_84, %c36] : memref<4x512xf32, #tpu.memory_space<vmem>>, vector<4x384xf32>
    %cst_85 = arith.constant dense<0.000000e+00> : vector<4x384xf32>
    %85 = tpu.matmul %83, %84, %cst_85 {dimension_numbers = #tpu.dot_dimension_numbers<[1], [0], [0], [1], [0, 0, 1, 1], [], []>} : vector<4x4xf32>, vector<4x384xf32>, vector<4x384xf32> -> vector<4x384xf32>
    %86 = arith.addf %81, %85 : vector<4x384xf32>
    %c7 = arith.constant 7 : index
    %c0_86 = arith.constant 0 : index
    %c0_87 = arith.constant 0 : index
    %87 = vector.load %arg3[%c7, %c0_86, %c0_87] : memref<9x4x4xf32, #tpu.memory_space<vmem>>, vector<1x4x4xf32>
    %88 = vector.shape_cast %87 : vector<1x4x4xf32> to vector<4x4xf32>
    %c0_88 = arith.constant 0 : index
    %c37_89 = arith.constant 37 : index
    %89 = vector.load %arg10[%c0_88, %c37_89] : memref<4x512xf32, #tpu.memory_space<vmem>>, vector<4x384xf32>
    %cst_90 = arith.constant dense<0.000000e+00> : vector<4x384xf32>
    %90 = tpu.matmul %88, %89, %cst_90 {dimension_numbers = #tpu.dot_dimension_numbers<[1], [0], [0], [1], [0, 0, 1, 1], [], []>} : vector<4x4xf32>, vector<4x384xf32>, vector<4x384xf32> -> vector<4x384xf32>
    %91 = arith.addf %86, %90 : vector<4x384xf32>
    %c8 = arith.constant 8 : index
    %c0_91 = arith.constant 0 : index
    %c0_92 = arith.constant 0 : index
    %92 = vector.load %arg3[%c8, %c0_91, %c0_92] : memref<9x4x4xf32, #tpu.memory_space<vmem>>, vector<1x4x4xf32>
    %93 = vector.shape_cast %92 : vector<1x4x4xf32> to vector<4x4xf32>
    %c0_93 = arith.constant 0 : index
    %c38 = arith.constant 38 : index
    %94 = vector.load %arg10[%c0_93, %c38] : memref<4x512xf32, #tpu.memory_space<vmem>>, vector<4x384xf32>
    %cst_94 = arith.constant dense<0.000000e+00> : vector<4x384xf32>
    %95 = tpu.matmul %93, %94, %cst_94 {dimension_numbers = #tpu.dot_dimension_numbers<[1], [0], [0], [1], [0, 0, 1, 1], [], []>} : vector<4x4xf32>, vector<4x384xf32>, vector<4x384xf32> -> vector<4x384xf32>
    %96 = arith.addf %91, %95 : vector<4x384xf32>
    %c0_95 = arith.constant 0 : index
    %c0_96 = arith.constant 0 : index
    %97 = vector.load %arg4[%c0_95, %c0_96] : memref<4x1xf32, #tpu.memory_space<vmem>>, vector<4x1xf32>
    %c0_97 = arith.constant 0 : index
    %c0_98 = arith.constant 0 : index
    %98 = vector.load %arg5[%c0_97, %c0_98] : memref<4x1xf32, #tpu.memory_space<vmem>>, vector<4x1xf32>
    %cst_99 = arith.constant 0.000000e+00 : f32
    %99 = vector.shape_cast %2 : vector<1x384xi1> to vector<1x384xi1>
    %100 = vector.broadcast %99 : vector<1x384xi1> to vector<4x384xi1>
    %101 = vector.broadcast %cst_99 : f32 to vector<4x384xf32>
    %102 = arith.select %100, %96, %101 : vector<4x384xi1>, vector<4x384xf32>
    %cst_100 = arith.constant dense<0.000000e+00> : vector<4xf32>
    %103 = vector.multi_reduction <add>, %102, %cst_100 [1] : vector<4x384xf32> to vector<4xf32>
    %104 = vector.shape_cast %103 : vector<4xf32> to vector<4x1xf32>
    %cst_101 = arith.constant 3.906250e-03 : f32
    %105 = vector.broadcast %cst_101 : f32 to vector<4x1xf32>
    %106 = arith.mulf %104, %105 : vector<4x1xf32>
    %107 = arith.mulf %96, %96 : vector<4x384xf32>
    %cst_102 = arith.constant 0.000000e+00 : f32
    %108 = vector.shape_cast %2 : vector<1x384xi1> to vector<1x384xi1>
    %109 = vector.broadcast %108 : vector<1x384xi1> to vector<4x384xi1>
    %110 = vector.broadcast %cst_102 : f32 to vector<4x384xf32>
    %111 = arith.select %109, %107, %110 : vector<4x384xi1>, vector<4x384xf32>
    %cst_103 = arith.constant dense<0.000000e+00> : vector<4xf32>
    %112 = vector.multi_reduction <add>, %111, %cst_103 [1] : vector<4x384xf32> to vector<4xf32>
    %113 = vector.shape_cast %112 : vector<4xf32> to vector<4x1xf32>
    %cst_104 = arith.constant 3.906250e-03 : f32
    %114 = vector.broadcast %cst_104 : f32 to vector<4x1xf32>
    %115 = arith.mulf %113, %114 : vector<4x1xf32>
    %116 = arith.mulf %106, %106 : vector<4x1xf32>
    %117 = arith.subf %115, %116 : vector<4x1xf32>
    %cst_105 = arith.constant 0.000000e+00 : f32
    %118 = vector.broadcast %cst_105 : f32 to vector<4x1xf32>
    %119 = arith.maximumf %117, %118 : vector<4x1xf32>
    %120 = vector.broadcast %106 : vector<4x1xf32> to vector<4x384xf32>
    %121 = arith.subf %96, %120 : vector<4x384xf32>
    %cst_106 = arith.constant 9.99999974E-6 : f32
    %122 = vector.broadcast %cst_106 : f32 to vector<4x1xf32>
    %123 = arith.addf %119, %122 : vector<4x1xf32>
    %124 = math.rsqrt %123 : vector<4x1xf32>
    %125 = arith.mulf %97, %124 : vector<4x1xf32>
    %126 = vector.broadcast %125 : vector<4x1xf32> to vector<4x384xf32>
    %127 = arith.mulf %121, %126 : vector<4x384xf32>
    %128 = vector.broadcast %98 : vector<4x1xf32> to vector<4x384xf32>
    %129 = arith.addf %127, %128 : vector<4x384xf32>
    %cst_107 = arith.constant 0.000000e+00 : f32
    %130 = vector.broadcast %cst_107 : f32 to vector<4x384xf32>
    %131 = arith.maximumf %129, %130 : vector<4x384xf32>
    %cst_108 = arith.constant 0.000000e+00 : f32
    %132 = vector.shape_cast %2 : vector<1x384xi1> to vector<1x384xi1>
    %133 = vector.broadcast %132 : vector<1x384xi1> to vector<4x384xi1>
    %134 = vector.broadcast %cst_108 : f32 to vector<4x384xf32>
    %135 = arith.select %133, %131, %134 : vector<4x384xi1>, vector<4x384xf32>
    %cst_109 = arith.constant 0.000000e+00 : f32
    %136 = vector.broadcast %cst_109 : f32 to vector<4x128xf32>
    %c0_110 = arith.constant 0 : index
    %c0_111 = arith.constant 0 : index
    %137 = vector.load %arg11[%c0_110, %c0_111] : memref<4x640xf32, #tpu.memory_space<vmem>>, vector<4x128xf32>
    tpu.vector_store %arg11[%c0_110, %c0_111], %136 {strides = array<i32>} : memref<4x640xf32, #tpu.memory_space<vmem>>, vector<4x128xf32>,
    %cst_112 = arith.constant 0.000000e+00 : f32
    %138 = vector.broadcast %cst_112 : f32 to vector<4x128xf32>
    %c0_113 = arith.constant 0 : index
    %c512 = arith.constant 512 : index
    %139 = vector.load %arg11[%c0_113, %c512] : memref<4x640xf32, #tpu.memory_space<vmem>>, vector<4x128xf32>
    tpu.vector_store %arg11[%c0_113, %c512], %138 {strides = array<i32>} : memref<4x640xf32, #tpu.memory_space<vmem>>, vector<4x128xf32>,
    %c0_114 = arith.constant 0 : index
    %c128_115 = arith.constant 128 : index
    %140 = vector.load %arg11[%c0_114, %c128_115] : memref<4x640xf32, #tpu.memory_space<vmem>>, vector<4x384xf32>
    tpu.vector_store %arg11[%c0_114, %c128_115], %135 {strides = array<i32>} : memref<4x640xf32, #tpu.memory_space<vmem>>, vector<4x384xf32>,
    %c0_116 = arith.constant 0 : index
    %c0_117 = arith.constant 0 : index
    %c0_118 = arith.constant 0 : index
    %141 = vector.load %arg6[%c0_116, %c0_117, %c0_118] : memref<9x4x4xf32, #tpu.memory_space<vmem>>, vector<1x4x4xf32>
    %142 = vector.shape_cast %141 : vector<1x4x4xf32> to vector<4x4xf32>
    %c0_119 = arith.constant 0 : index
    %c109_120 = arith.constant 109 : index
    %143 = vector.load %arg11[%c0_119, %c109_120] : memref<4x640xf32, #tpu.memory_space<vmem>>, vector<4x384xf32>
    %cst_121 = arith.constant dense<0.000000e+00> : vector<4x384xf32>
    %144 = tpu.matmul %142, %143, %cst_121 {dimension_numbers = #tpu.dot_dimension_numbers<[1], [0], [0], [1], [0, 0, 1, 1], [], []>} : vector<4x4xf32>, vector<4x384xf32>, vector<4x384xf32> -> vector<4x384xf32>
    %c1_122 = arith.constant 1 : index
    %c0_123 = arith.constant 0 : index
    %c0_124 = arith.constant 0 : index
    %145 = vector.load %arg6[%c1_122, %c0_123, %c0_124] : memref<9x4x4xf32, #tpu.memory_space<vmem>>, vector<1x4x4xf32>
    %146 = vector.shape_cast %145 : vector<1x4x4xf32> to vector<4x4xf32>
    %c0_125 = arith.constant 0 : index
    %c110 = arith.constant 110 : index
    %147 = vector.load %arg11[%c0_125, %c110] : memref<4x640xf32, #tpu.memory_space<vmem>>, vector<4x384xf32>
    %cst_126 = arith.constant dense<0.000000e+00> : vector<4x384xf32>
    %148 = tpu.matmul %146, %147, %cst_126 {dimension_numbers = #tpu.dot_dimension_numbers<[1], [0], [0], [1], [0, 0, 1, 1], [], []>} : vector<4x4xf32>, vector<4x384xf32>, vector<4x384xf32> -> vector<4x384xf32>
    %149 = arith.addf %144, %148 : vector<4x384xf32>
    %c2_127 = arith.constant 2 : index
    %c0_128 = arith.constant 0 : index
    %c0_129 = arith.constant 0 : index
    %150 = vector.load %arg6[%c2_127, %c0_128, %c0_129] : memref<9x4x4xf32, #tpu.memory_space<vmem>>, vector<1x4x4xf32>
    %151 = vector.shape_cast %150 : vector<1x4x4xf32> to vector<4x4xf32>
    %c0_130 = arith.constant 0 : index
    %c111 = arith.constant 111 : index
    %152 = vector.load %arg11[%c0_130, %c111] : memref<4x640xf32, #tpu.memory_space<vmem>>, vector<4x384xf32>
    %cst_131 = arith.constant dense<0.000000e+00> : vector<4x384xf32>
    %153 = tpu.matmul %151, %152, %cst_131 {dimension_numbers = #tpu.dot_dimension_numbers<[1], [0], [0], [1], [0, 0, 1, 1], [], []>} : vector<4x4xf32>, vector<4x384xf32>, vector<4x384xf32> -> vector<4x384xf32>
    %154 = arith.addf %149, %153 : vector<4x384xf32>
    %c3_132 = arith.constant 3 : index
    %c0_133 = arith.constant 0 : index
    %c0_134 = arith.constant 0 : index
    %155 = vector.load %arg6[%c3_132, %c0_133, %c0_134] : memref<9x4x4xf32, #tpu.memory_space<vmem>>, vector<1x4x4xf32>
    %156 = vector.shape_cast %155 : vector<1x4x4xf32> to vector<4x4xf32>
    %c0_135 = arith.constant 0 : index
    %c127_136 = arith.constant 127 : index
    %157 = vector.load %arg11[%c0_135, %c127_136] : memref<4x640xf32, #tpu.memory_space<vmem>>, vector<4x384xf32>
    %cst_137 = arith.constant dense<0.000000e+00> : vector<4x384xf32>
    %158 = tpu.matmul %156, %157, %cst_137 {dimension_numbers = #tpu.dot_dimension_numbers<[1], [0], [0], [1], [0, 0, 1, 1], [], []>} : vector<4x4xf32>, vector<4x384xf32>, vector<4x384xf32> -> vector<4x384xf32>
    %159 = arith.addf %154, %158 : vector<4x384xf32>
    %c4_138 = arith.constant 4 : index
    %c0_139 = arith.constant 0 : index
    %c0_140 = arith.constant 0 : index
    %160 = vector.load %arg6[%c4_138, %c0_139, %c0_140] : memref<9x4x4xf32, #tpu.memory_space<vmem>>, vector<1x4x4xf32>
    %161 = vector.shape_cast %160 : vector<1x4x4xf32> to vector<4x4xf32>
    %c0_141 = arith.constant 0 : index
    %c128_142 = arith.constant 128 : index
    %162 = vector.load %arg11[%c0_141, %c128_142] : memref<4x640xf32, #tpu.memory_space<vmem>>, vector<4x384xf32>
    %cst_143 = arith.constant dense<0.000000e+00> : vector<4x384xf32>
    %163 = tpu.matmul %161, %162, %cst_143 {dimension_numbers = #tpu.dot_dimension_numbers<[1], [0], [0], [1], [0, 0, 1, 1], [], []>} : vector<4x4xf32>, vector<4x384xf32>, vector<4x384xf32> -> vector<4x384xf32>
    %164 = arith.addf %159, %163 : vector<4x384xf32>
    %c5_144 = arith.constant 5 : index
    %c0_145 = arith.constant 0 : index
    %c0_146 = arith.constant 0 : index
    %165 = vector.load %arg6[%c5_144, %c0_145, %c0_146] : memref<9x4x4xf32, #tpu.memory_space<vmem>>, vector<1x4x4xf32>
    %166 = vector.shape_cast %165 : vector<1x4x4xf32> to vector<4x4xf32>
    %c0_147 = arith.constant 0 : index
    %c129 = arith.constant 129 : index
    %167 = vector.load %arg11[%c0_147, %c129] : memref<4x640xf32, #tpu.memory_space<vmem>>, vector<4x384xf32>
    %cst_148 = arith.constant dense<0.000000e+00> : vector<4x384xf32>
    %168 = tpu.matmul %166, %167, %cst_148 {dimension_numbers = #tpu.dot_dimension_numbers<[1], [0], [0], [1], [0, 0, 1, 1], [], []>} : vector<4x4xf32>, vector<4x384xf32>, vector<4x384xf32> -> vector<4x384xf32>
    %169 = arith.addf %164, %168 : vector<4x384xf32>
    %c6_149 = arith.constant 6 : index
    %c0_150 = arith.constant 0 : index
    %c0_151 = arith.constant 0 : index
    %170 = vector.load %arg6[%c6_149, %c0_150, %c0_151] : memref<9x4x4xf32, #tpu.memory_space<vmem>>, vector<1x4x4xf32>
    %171 = vector.shape_cast %170 : vector<1x4x4xf32> to vector<4x4xf32>
    %c0_152 = arith.constant 0 : index
    %c145_153 = arith.constant 145 : index
    %172 = vector.load %arg11[%c0_152, %c145_153] : memref<4x640xf32, #tpu.memory_space<vmem>>, vector<4x384xf32>
    %cst_154 = arith.constant dense<0.000000e+00> : vector<4x384xf32>
    %173 = tpu.matmul %171, %172, %cst_154 {dimension_numbers = #tpu.dot_dimension_numbers<[1], [0], [0], [1], [0, 0, 1, 1], [], []>} : vector<4x4xf32>, vector<4x384xf32>, vector<4x384xf32> -> vector<4x384xf32>
    %174 = arith.addf %169, %173 : vector<4x384xf32>
    %c7_155 = arith.constant 7 : index
    %c0_156 = arith.constant 0 : index
    %c0_157 = arith.constant 0 : index
    %175 = vector.load %arg6[%c7_155, %c0_156, %c0_157] : memref<9x4x4xf32, #tpu.memory_space<vmem>>, vector<1x4x4xf32>
    %176 = vector.shape_cast %175 : vector<1x4x4xf32> to vector<4x4xf32>
    %c0_158 = arith.constant 0 : index
    %c146 = arith.constant 146 : index
    %177 = vector.load %arg11[%c0_158, %c146] : memref<4x640xf32, #tpu.memory_space<vmem>>, vector<4x384xf32>
    %cst_159 = arith.constant dense<0.000000e+00> : vector<4x384xf32>
    %178 = tpu.matmul %176, %177, %cst_159 {dimension_numbers = #tpu.dot_dimension_numbers<[1], [0], [0], [1], [0, 0, 1, 1], [], []>} : vector<4x4xf32>, vector<4x384xf32>, vector<4x384xf32> -> vector<4x384xf32>
    %179 = arith.addf %174, %178 : vector<4x384xf32>
    %c8_160 = arith.constant 8 : index
    %c0_161 = arith.constant 0 : index
    %c0_162 = arith.constant 0 : index
    %180 = vector.load %arg6[%c8_160, %c0_161, %c0_162] : memref<9x4x4xf32, #tpu.memory_space<vmem>>, vector<1x4x4xf32>
    %181 = vector.shape_cast %180 : vector<1x4x4xf32> to vector<4x4xf32>
    %c0_163 = arith.constant 0 : index
    %c147 = arith.constant 147 : index
    %182 = vector.load %arg11[%c0_163, %c147] : memref<4x640xf32, #tpu.memory_space<vmem>>, vector<4x384xf32>
    %cst_164 = arith.constant dense<0.000000e+00> : vector<4x384xf32>
    %183 = tpu.matmul %181, %182, %cst_164 {dimension_numbers = #tpu.dot_dimension_numbers<[1], [0], [0], [1], [0, 0, 1, 1], [], []>} : vector<4x4xf32>, vector<4x384xf32>, vector<4x384xf32> -> vector<4x384xf32>
    %184 = arith.addf %179, %183 : vector<4x384xf32>
    %c0_165 = arith.constant 0 : index
    %c0_166 = arith.constant 0 : index
    %185 = vector.load %arg7[%c0_165, %c0_166] : memref<4x1xf32, #tpu.memory_space<vmem>>, vector<4x1xf32>
    %c0_167 = arith.constant 0 : index
    %c0_168 = arith.constant 0 : index
    %186 = vector.load %arg8[%c0_167, %c0_168] : memref<4x1xf32, #tpu.memory_space<vmem>>, vector<4x1xf32>
    %cst_169 = arith.constant 0.000000e+00 : f32
    %187 = vector.shape_cast %2 : vector<1x384xi1> to vector<1x384xi1>
    %188 = vector.broadcast %187 : vector<1x384xi1> to vector<4x384xi1>
    %189 = vector.broadcast %cst_169 : f32 to vector<4x384xf32>
    %190 = arith.select %188, %184, %189 : vector<4x384xi1>, vector<4x384xf32>
    %cst_170 = arith.constant dense<0.000000e+00> : vector<4xf32>
    %191 = vector.multi_reduction <add>, %190, %cst_170 [1] : vector<4x384xf32> to vector<4xf32>
    %192 = vector.shape_cast %191 : vector<4xf32> to vector<4x1xf32>
    %cst_171 = arith.constant 3.906250e-03 : f32
    %193 = vector.broadcast %cst_171 : f32 to vector<4x1xf32>
    %194 = arith.mulf %192, %193 : vector<4x1xf32>
    %195 = arith.mulf %184, %184 : vector<4x384xf32>
    %cst_172 = arith.constant 0.000000e+00 : f32
    %196 = vector.shape_cast %2 : vector<1x384xi1> to vector<1x384xi1>
    %197 = vector.broadcast %196 : vector<1x384xi1> to vector<4x384xi1>
    %198 = vector.broadcast %cst_172 : f32 to vector<4x384xf32>
    %199 = arith.select %197, %195, %198 : vector<4x384xi1>, vector<4x384xf32>
    %cst_173 = arith.constant dense<0.000000e+00> : vector<4xf32>
    %200 = vector.multi_reduction <add>, %199, %cst_173 [1] : vector<4x384xf32> to vector<4xf32>
    %201 = vector.shape_cast %200 : vector<4xf32> to vector<4x1xf32>
    %cst_174 = arith.constant 3.906250e-03 : f32
    %202 = vector.broadcast %cst_174 : f32 to vector<4x1xf32>
    %203 = arith.mulf %201, %202 : vector<4x1xf32>
    %204 = arith.mulf %194, %194 : vector<4x1xf32>
    %205 = arith.subf %203, %204 : vector<4x1xf32>
    %cst_175 = arith.constant 0.000000e+00 : f32
    %206 = vector.broadcast %cst_175 : f32 to vector<4x1xf32>
    %207 = arith.maximumf %205, %206 : vector<4x1xf32>
    %208 = vector.broadcast %194 : vector<4x1xf32> to vector<4x384xf32>
    %209 = arith.subf %184, %208 : vector<4x384xf32>
    %cst_176 = arith.constant 9.99999974E-6 : f32
    %210 = vector.broadcast %cst_176 : f32 to vector<4x1xf32>
    %211 = arith.addf %207, %210 : vector<4x1xf32>
    %212 = math.rsqrt %211 : vector<4x1xf32>
    %213 = arith.mulf %185, %212 : vector<4x1xf32>
    %214 = vector.broadcast %213 : vector<4x1xf32> to vector<4x384xf32>
    %215 = arith.mulf %209, %214 : vector<4x384xf32>
    %216 = vector.broadcast %186 : vector<4x1xf32> to vector<4x384xf32>
    %217 = arith.addf %215, %216 : vector<4x384xf32>
    %218 = vector.extract_strided_slice %217 {offsets = [0, 0], sizes = [4, 16], strides = [1, 1]} : vector<4x384xf32> to vector<4x16xf32>
    %c0_177 = arith.constant 0 : index
    %c0_178 = arith.constant 0 : index
    %c0_179 = arith.constant 0 : index
    %219 = vector.load %arg1[%c0_177, %c0_178, %c0_179] : memref<1x4x256xf32, #tpu.memory_space<vmem>>, vector<1x4x16xf32>
    %220 = vector.shape_cast %219 : vector<1x4x16xf32> to vector<4x16xf32>
    %221 = arith.addf %218, %220 : vector<4x16xf32>
    %c0_180 = arith.constant 0 : index
    %c0_181 = arith.constant 0 : index
    %c0_182 = arith.constant 0 : index
    %222 = vector.load %arg9[%c0_180, %c0_181, %c0_182] : memref<1x4x256xf32, #tpu.memory_space<vmem>>, vector<1x4x16xf32>
    %223 = vector.shape_cast %222 : vector<1x4x16xf32> to vector<4x16xf32>
    %224 = vector.shape_cast %221 : vector<4x16xf32> to vector<1x4x16xf32>
    tpu.vector_store %arg9[%c0_180, %c0_181, %c0_182], %224 {strides = array<i32>} : memref<1x4x256xf32, #tpu.memory_space<vmem>>, vector<1x4x16xf32>,
    %225 = vector.extract_strided_slice %217 {offsets = [0, 18], sizes = [4, 16], strides = [1, 1]} : vector<4x384xf32> to vector<4x16xf32>
    %c0_183 = arith.constant 0 : index
    %c0_184 = arith.constant 0 : index
    %c16_185 = arith.constant 16 : index
    %226 = vector.load %arg1[%c0_183, %c0_184, %c16_185] : memref<1x4x256xf32, #tpu.memory_space<vmem>>, vector<1x4x16xf32>
    %227 = vector.shape_cast %226 : vector<1x4x16xf32> to vector<4x16xf32>
    %228 = arith.addf %225, %227 : vector<4x16xf32>
    %c0_186 = arith.constant 0 : index
    %c0_187 = arith.constant 0 : index
    %c16_188 = arith.constant 16 : index
    %229 = vector.load %arg9[%c0_186, %c0_187, %c16_188] : memref<1x4x256xf32, #tpu.memory_space<vmem>>, vector<1x4x16xf32>
    %230 = vector.shape_cast %229 : vector<1x4x16xf32> to vector<4x16xf32>
    %231 = vector.shape_cast %228 : vector<4x16xf32> to vector<1x4x16xf32>
    tpu.vector_store %arg9[%c0_186, %c0_187, %c16_188], %231 {strides = array<i32>} : memref<1x4x256xf32, #tpu.memory_space<vmem>>, vector<1x4x16xf32>,
    %232 = vector.extract_strided_slice %217 {offsets = [0, 36], sizes = [4, 16], strides = [1, 1]} : vector<4x384xf32> to vector<4x16xf32>
    %c0_189 = arith.constant 0 : index
    %c0_190 = arith.constant 0 : index
    %c32_191 = arith.constant 32 : index
    %233 = vector.load %arg1[%c0_189, %c0_190, %c32_191] : memref<1x4x256xf32, #tpu.memory_space<vmem>>, vector<1x4x16xf32>
    %234 = vector.shape_cast %233 : vector<1x4x16xf32> to vector<4x16xf32>
    %235 = arith.addf %232, %234 : vector<4x16xf32>
    %c0_192 = arith.constant 0 : index
    %c0_193 = arith.constant 0 : index
    %c32_194 = arith.constant 32 : index
    %236 = vector.load %arg9[%c0_192, %c0_193, %c32_194] : memref<1x4x256xf32, #tpu.memory_space<vmem>>, vector<1x4x16xf32>
    %237 = vector.shape_cast %236 : vector<1x4x16xf32> to vector<4x16xf32>
    %238 = vector.shape_cast %235 : vector<4x16xf32> to vector<1x4x16xf32>
    tpu.vector_store %arg9[%c0_192, %c0_193, %c32_194], %238 {strides = array<i32>} : memref<1x4x256xf32, #tpu.memory_space<vmem>>, vector<1x4x16xf32>,
    %239 = vector.extract_strided_slice %217 {offsets = [0, 54], sizes = [4, 16], strides = [1, 1]} : vector<4x384xf32> to vector<4x16xf32>
    %c0_195 = arith.constant 0 : index
    %c0_196 = arith.constant 0 : index
    %c48_197 = arith.constant 48 : index
    %240 = vector.load %arg1[%c0_195, %c0_196, %c48_197] : memref<1x4x256xf32, #tpu.memory_space<vmem>>, vector<1x4x16xf32>
    %241 = vector.shape_cast %240 : vector<1x4x16xf32> to vector<4x16xf32>
    %242 = arith.addf %239, %241 : vector<4x16xf32>
    %c0_198 = arith.constant 0 : index
    %c0_199 = arith.constant 0 : index
    %c48_200 = arith.constant 48 : index
    %243 = vector.load %arg9[%c0_198, %c0_199, %c48_200] : memref<1x4x256xf32, #tpu.memory_space<vmem>>, vector<1x4x16xf32>
    %244 = vector.shape_cast %243 : vector<1x4x16xf32> to vector<4x16xf32>
    %245 = vector.shape_cast %242 : vector<4x16xf32> to vector<1x4x16xf32>
    tpu.vector_store %arg9[%c0_198, %c0_199, %c48_200], %245 {strides = array<i32>} : memref<1x4x256xf32, #tpu.memory_space<vmem>>, vector<1x4x16xf32>,
    %246 = vector.extract_strided_slice %217 {offsets = [0, 72], sizes = [4, 16], strides = [1, 1]} : vector<4x384xf32> to vector<4x16xf32>
    %c0_201 = arith.constant 0 : index
    %c0_202 = arith.constant 0 : index
    %c64_203 = arith.constant 64 : index
    %247 = vector.load %arg1[%c0_201, %c0_202, %c64_203] : memref<1x4x256xf32, #tpu.memory_space<vmem>>, vector<1x4x16xf32>
    %248 = vector.shape_cast %247 : vector<1x4x16xf32> to vector<4x16xf32>
    %249 = arith.addf %246, %248 : vector<4x16xf32>
    %c0_204 = arith.constant 0 : index
    %c0_205 = arith.constant 0 : index
    %c64_206 = arith.constant 64 : index
    %250 = vector.load %arg9[%c0_204, %c0_205, %c64_206] : memref<1x4x256xf32, #tpu.memory_space<vmem>>, vector<1x4x16xf32>
    %251 = vector.shape_cast %250 : vector<1x4x16xf32> to vector<4x16xf32>
    %252 = vector.shape_cast %249 : vector<4x16xf32> to vector<1x4x16xf32>
    tpu.vector_store %arg9[%c0_204, %c0_205, %c64_206], %252 {strides = array<i32>} : memref<1x4x256xf32, #tpu.memory_space<vmem>>, vector<1x4x16xf32>,
    %253 = vector.extract_strided_slice %217 {offsets = [0, 90], sizes = [4, 16], strides = [1, 1]} : vector<4x384xf32> to vector<4x16xf32>
    %c0_207 = arith.constant 0 : index
    %c0_208 = arith.constant 0 : index
    %c80_209 = arith.constant 80 : index
    %254 = vector.load %arg1[%c0_207, %c0_208, %c80_209] : memref<1x4x256xf32, #tpu.memory_space<vmem>>, vector<1x4x16xf32>
    %255 = vector.shape_cast %254 : vector<1x4x16xf32> to vector<4x16xf32>
    %256 = arith.addf %253, %255 : vector<4x16xf32>
    %c0_210 = arith.constant 0 : index
    %c0_211 = arith.constant 0 : index
    %c80_212 = arith.constant 80 : index
    %257 = vector.load %arg9[%c0_210, %c0_211, %c80_212] : memref<1x4x256xf32, #tpu.memory_space<vmem>>, vector<1x4x16xf32>
    %258 = vector.shape_cast %257 : vector<1x4x16xf32> to vector<4x16xf32>
    %259 = vector.shape_cast %256 : vector<4x16xf32> to vector<1x4x16xf32>
    tpu.vector_store %arg9[%c0_210, %c0_211, %c80_212], %259 {strides = array<i32>} : memref<1x4x256xf32, #tpu.memory_space<vmem>>, vector<1x4x16xf32>,
    %260 = vector.extract_strided_slice %217 {offsets = [0, 108], sizes = [4, 16], strides = [1, 1]} : vector<4x384xf32> to vector<4x16xf32>
    %c0_213 = arith.constant 0 : index
    %c0_214 = arith.constant 0 : index
    %c96_215 = arith.constant 96 : index
    %261 = vector.load %arg1[%c0_213, %c0_214, %c96_215] : memref<1x4x256xf32, #tpu.memory_space<vmem>>, vector<1x4x16xf32>
    %262 = vector.shape_cast %261 : vector<1x4x16xf32> to vector<4x16xf32>
    %263 = arith.addf %260, %262 : vector<4x16xf32>
    %c0_216 = arith.constant 0 : index
    %c0_217 = arith.constant 0 : index
    %c96_218 = arith.constant 96 : index
    %264 = vector.load %arg9[%c0_216, %c0_217, %c96_218] : memref<1x4x256xf32, #tpu.memory_space<vmem>>, vector<1x4x16xf32>
    %265 = vector.shape_cast %264 : vector<1x4x16xf32> to vector<4x16xf32>
    %266 = vector.shape_cast %263 : vector<4x16xf32> to vector<1x4x16xf32>
    tpu.vector_store %arg9[%c0_216, %c0_217, %c96_218], %266 {strides = array<i32>} : memref<1x4x256xf32, #tpu.memory_space<vmem>>, vector<1x4x16xf32>,
    %267 = vector.extract_strided_slice %217 {offsets = [0, 126], sizes = [4, 16], strides = [1, 1]} : vector<4x384xf32> to vector<4x16xf32>
    %c0_219 = arith.constant 0 : index
    %c0_220 = arith.constant 0 : index
    %c112_221 = arith.constant 112 : index
    %268 = vector.load %arg1[%c0_219, %c0_220, %c112_221] : memref<1x4x256xf32, #tpu.memory_space<vmem>>, vector<1x4x16xf32>
    %269 = vector.shape_cast %268 : vector<1x4x16xf32> to vector<4x16xf32>
    %270 = arith.addf %267, %269 : vector<4x16xf32>
    %c0_222 = arith.constant 0 : index
    %c0_223 = arith.constant 0 : index
    %c112_224 = arith.constant 112 : index
    %271 = vector.load %arg9[%c0_222, %c0_223, %c112_224] : memref<1x4x256xf32, #tpu.memory_space<vmem>>, vector<1x4x16xf32>
    %272 = vector.shape_cast %271 : vector<1x4x16xf32> to vector<4x16xf32>
    %273 = vector.shape_cast %270 : vector<4x16xf32> to vector<1x4x16xf32>
    tpu.vector_store %arg9[%c0_222, %c0_223, %c112_224], %273 {strides = array<i32>} : memref<1x4x256xf32, #tpu.memory_space<vmem>>, vector<1x4x16xf32>,
    %274 = vector.extract_strided_slice %217 {offsets = [0, 144], sizes = [4, 16], strides = [1, 1]} : vector<4x384xf32> to vector<4x16xf32>
    %c0_225 = arith.constant 0 : index
    %c0_226 = arith.constant 0 : index
    %c128_227 = arith.constant 128 : index
    %275 = vector.load %arg1[%c0_225, %c0_226, %c128_227] : memref<1x4x256xf32, #tpu.memory_space<vmem>>, vector<1x4x16xf32>
    %276 = vector.shape_cast %275 : vector<1x4x16xf32> to vector<4x16xf32>
    %277 = arith.addf %274, %276 : vector<4x16xf32>
    %c0_228 = arith.constant 0 : index
    %c0_229 = arith.constant 0 : index
    %c128_230 = arith.constant 128 : index
    %278 = vector.load %arg9[%c0_228, %c0_229, %c128_230] : memref<1x4x256xf32, #tpu.memory_space<vmem>>, vector<1x4x16xf32>
    %279 = vector.shape_cast %278 : vector<1x4x16xf32> to vector<4x16xf32>
    %280 = vector.shape_cast %277 : vector<4x16xf32> to vector<1x4x16xf32>
    tpu.vector_store %arg9[%c0_228, %c0_229, %c128_230], %280 {strides = array<i32>} : memref<1x4x256xf32, #tpu.memory_space<vmem>>, vector<1x4x16xf32>,
    %281 = vector.extract_strided_slice %217 {offsets = [0, 162], sizes = [4, 16], strides = [1, 1]} : vector<4x384xf32> to vector<4x16xf32>
    %c0_231 = arith.constant 0 : index
    %c0_232 = arith.constant 0 : index
    %c144_233 = arith.constant 144 : index
    %282 = vector.load %arg1[%c0_231, %c0_232, %c144_233] : memref<1x4x256xf32, #tpu.memory_space<vmem>>, vector<1x4x16xf32>
    %283 = vector.shape_cast %282 : vector<1x4x16xf32> to vector<4x16xf32>
    %284 = arith.addf %281, %283 : vector<4x16xf32>
    %c0_234 = arith.constant 0 : index
    %c0_235 = arith.constant 0 : index
    %c144_236 = arith.constant 144 : index
    %285 = vector.load %arg9[%c0_234, %c0_235, %c144_236] : memref<1x4x256xf32, #tpu.memory_space<vmem>>, vector<1x4x16xf32>
    %286 = vector.shape_cast %285 : vector<1x4x16xf32> to vector<4x16xf32>
    %287 = vector.shape_cast %284 : vector<4x16xf32> to vector<1x4x16xf32>
    tpu.vector_store %arg9[%c0_234, %c0_235, %c144_236], %287 {strides = array<i32>} : memref<1x4x256xf32, #tpu.memory_space<vmem>>, vector<1x4x16xf32>,
    %288 = vector.extract_strided_slice %217 {offsets = [0, 180], sizes = [4, 16], strides = [1, 1]} : vector<4x384xf32> to vector<4x16xf32>
    %c0_237 = arith.constant 0 : index
    %c0_238 = arith.constant 0 : index
    %c160_239 = arith.constant 160 : index
    %289 = vector.load %arg1[%c0_237, %c0_238, %c160_239] : memref<1x4x256xf32, #tpu.memory_space<vmem>>, vector<1x4x16xf32>
    %290 = vector.shape_cast %289 : vector<1x4x16xf32> to vector<4x16xf32>
    %291 = arith.addf %288, %290 : vector<4x16xf32>
    %c0_240 = arith.constant 0 : index
    %c0_241 = arith.constant 0 : index
    %c160_242 = arith.constant 160 : index
    %292 = vector.load %arg9[%c0_240, %c0_241, %c160_242] : memref<1x4x256xf32, #tpu.memory_space<vmem>>, vector<1x4x16xf32>
    %293 = vector.shape_cast %292 : vector<1x4x16xf32> to vector<4x16xf32>
    %294 = vector.shape_cast %291 : vector<4x16xf32> to vector<1x4x16xf32>
    tpu.vector_store %arg9[%c0_240, %c0_241, %c160_242], %294 {strides = array<i32>} : memref<1x4x256xf32, #tpu.memory_space<vmem>>, vector<1x4x16xf32>,
    %295 = vector.extract_strided_slice %217 {offsets = [0, 198], sizes = [4, 16], strides = [1, 1]} : vector<4x384xf32> to vector<4x16xf32>
    %c0_243 = arith.constant 0 : index
    %c0_244 = arith.constant 0 : index
    %c176_245 = arith.constant 176 : index
    %296 = vector.load %arg1[%c0_243, %c0_244, %c176_245] : memref<1x4x256xf32, #tpu.memory_space<vmem>>, vector<1x4x16xf32>
    %297 = vector.shape_cast %296 : vector<1x4x16xf32> to vector<4x16xf32>
    %298 = arith.addf %295, %297 : vector<4x16xf32>
    %c0_246 = arith.constant 0 : index
    %c0_247 = arith.constant 0 : index
    %c176_248 = arith.constant 176 : index
    %299 = vector.load %arg9[%c0_246, %c0_247, %c176_248] : memref<1x4x256xf32, #tpu.memory_space<vmem>>, vector<1x4x16xf32>
    %300 = vector.shape_cast %299 : vector<1x4x16xf32> to vector<4x16xf32>
    %301 = vector.shape_cast %298 : vector<4x16xf32> to vector<1x4x16xf32>
    tpu.vector_store %arg9[%c0_246, %c0_247, %c176_248], %301 {strides = array<i32>} : memref<1x4x256xf32, #tpu.memory_space<vmem>>, vector<1x4x16xf32>,
    %302 = vector.extract_strided_slice %217 {offsets = [0, 216], sizes = [4, 16], strides = [1, 1]} : vector<4x384xf32> to vector<4x16xf32>
    %c0_249 = arith.constant 0 : index
    %c0_250 = arith.constant 0 : index
    %c192_251 = arith.constant 192 : index
    %303 = vector.load %arg1[%c0_249, %c0_250, %c192_251] : memref<1x4x256xf32, #tpu.memory_space<vmem>>, vector<1x4x16xf32>
    %304 = vector.shape_cast %303 : vector<1x4x16xf32> to vector<4x16xf32>
    %305 = arith.addf %302, %304 : vector<4x16xf32>
    %c0_252 = arith.constant 0 : index
    %c0_253 = arith.constant 0 : index
    %c192_254 = arith.constant 192 : index
    %306 = vector.load %arg9[%c0_252, %c0_253, %c192_254] : memref<1x4x256xf32, #tpu.memory_space<vmem>>, vector<1x4x16xf32>
    %307 = vector.shape_cast %306 : vector<1x4x16xf32> to vector<4x16xf32>
    %308 = vector.shape_cast %305 : vector<4x16xf32> to vector<1x4x16xf32>
    tpu.vector_store %arg9[%c0_252, %c0_253, %c192_254], %308 {strides = array<i32>} : memref<1x4x256xf32, #tpu.memory_space<vmem>>, vector<1x4x16xf32>,
    %309 = vector.extract_strided_slice %217 {offsets = [0, 234], sizes = [4, 16], strides = [1, 1]} : vector<4x384xf32> to vector<4x16xf32>
    %c0_255 = arith.constant 0 : index
    %c0_256 = arith.constant 0 : index
    %c208_257 = arith.constant 208 : index
    %310 = vector.load %arg1[%c0_255, %c0_256, %c208_257] : memref<1x4x256xf32, #tpu.memory_space<vmem>>, vector<1x4x16xf32>
    %311 = vector.shape_cast %310 : vector<1x4x16xf32> to vector<4x16xf32>
    %312 = arith.addf %309, %311 : vector<4x16xf32>
    %c0_258 = arith.constant 0 : index
    %c0_259 = arith.constant 0 : index
    %c208_260 = arith.constant 208 : index
    %313 = vector.load %arg9[%c0_258, %c0_259, %c208_260] : memref<1x4x256xf32, #tpu.memory_space<vmem>>, vector<1x4x16xf32>
    %314 = vector.shape_cast %313 : vector<1x4x16xf32> to vector<4x16xf32>
    %315 = vector.shape_cast %312 : vector<4x16xf32> to vector<1x4x16xf32>
    tpu.vector_store %arg9[%c0_258, %c0_259, %c208_260], %315 {strides = array<i32>} : memref<1x4x256xf32, #tpu.memory_space<vmem>>, vector<1x4x16xf32>,
    %316 = vector.extract_strided_slice %217 {offsets = [0, 252], sizes = [4, 16], strides = [1, 1]} : vector<4x384xf32> to vector<4x16xf32>
    %c0_261 = arith.constant 0 : index
    %c0_262 = arith.constant 0 : index
    %c224_263 = arith.constant 224 : index
    %317 = vector.load %arg1[%c0_261, %c0_262, %c224_263] : memref<1x4x256xf32, #tpu.memory_space<vmem>>, vector<1x4x16xf32>
    %318 = vector.shape_cast %317 : vector<1x4x16xf32> to vector<4x16xf32>
    %319 = arith.addf %316, %318 : vector<4x16xf32>
    %c0_264 = arith.constant 0 : index
    %c0_265 = arith.constant 0 : index
    %c224_266 = arith.constant 224 : index
    %320 = vector.load %arg9[%c0_264, %c0_265, %c224_266] : memref<1x4x256xf32, #tpu.memory_space<vmem>>, vector<1x4x16xf32>
    %321 = vector.shape_cast %320 : vector<1x4x16xf32> to vector<4x16xf32>
    %322 = vector.shape_cast %319 : vector<4x16xf32> to vector<1x4x16xf32>
    tpu.vector_store %arg9[%c0_264, %c0_265, %c224_266], %322 {strides = array<i32>} : memref<1x4x256xf32, #tpu.memory_space<vmem>>, vector<1x4x16xf32>,
    %323 = vector.extract_strided_slice %217 {offsets = [0, 270], sizes = [4, 16], strides = [1, 1]} : vector<4x384xf32> to vector<4x16xf32>
    %c0_267 = arith.constant 0 : index
    %c0_268 = arith.constant 0 : index
    %c240_269 = arith.constant 240 : index
    %324 = vector.load %arg1[%c0_267, %c0_268, %c240_269] : memref<1x4x256xf32, #tpu.memory_space<vmem>>, vector<1x4x16xf32>
    %325 = vector.shape_cast %324 : vector<1x4x16xf32> to vector<4x16xf32>
    %326 = arith.addf %323, %325 : vector<4x16xf32>
    %c0_270 = arith.constant 0 : index
    %c0_271 = arith.constant 0 : index
    %c240_272 = arith.constant 240 : index
    %327 = vector.load %arg9[%c0_270, %c0_271, %c240_272] : memref<1x4x256xf32, #tpu.memory_space<vmem>>, vector<1x4x16xf32>
    %328 = vector.shape_cast %327 : vector<1x4x16xf32> to vector<4x16xf32>
    %329 = vector.shape_cast %326 : vector<4x16xf32> to vector<1x4x16xf32>
    tpu.vector_store %arg9[%c0_270, %c0_271, %c240_272], %329 {strides = array<i32>} : memref<1x4x256xf32, #tpu.memory_space<vmem>>, vector<1x4x16xf32>,
    return
  }
  func.func @transform_0(%arg0: i32) -> (i32, i32, i32) {
    %c0_i32 = arith.constant 0 : i32
    %c0_i32_0 = arith.constant 0 : i32
    %c0_i32_1 = arith.constant 0 : i32
    return %arg0, %c0_i32, %c0_i32_0 : i32, i32, i32
  }
  func.func @transform_1(%arg0: i32) -> (i32, i32) {
    %c0_i32 = arith.constant 0 : i32
    %c0_i32_0 = arith.constant 0 : i32
    %c0_i32_1 = arith.constant 0 : i32
    return %c0_i32, %c0_i32_0 : i32, i32
  }
  func.func @transform_2(%arg0: i32) -> (i32, i32, i32) {
    %c0_i32 = arith.constant 0 : i32
    %c0_i32_0 = arith.constant 0 : i32
    %c0_i32_1 = arith.constant 0 : i32
    %c0_i32_2 = arith.constant 0 : i32
    return %c0_i32, %c0_i32_0, %c0_i32_1 : i32, i32, i32
  }
  func.func @transform_3(%arg0: i32) -> (i32, i32) {
    %c0_i32 = arith.constant 0 : i32
    %c0_i32_0 = arith.constant 0 : i32
    %c0_i32_1 = arith.constant 0 : i32
    return %c0_i32, %c0_i32_0 : i32, i32
  }
  func.func @transform_4(%arg0: i32) -> (i32, i32) {
    %c0_i32 = arith.constant 0 : i32
    %c0_i32_0 = arith.constant 0 : i32
    %c0_i32_1 = arith.constant 0 : i32
    return %c0_i32, %c0_i32_0 : i32, i32
  }
  func.func @transform_5(%arg0: i32) -> (i32, i32, i32) {
    %c0_i32 = arith.constant 0 : i32
    %c0_i32_0 = arith.constant 0 : i32
    %c0_i32_1 = arith.constant 0 : i32
    %c0_i32_2 = arith.constant 0 : i32
    return %c0_i32, %c0_i32_0, %c0_i32_1 : i32, i32, i32
  }
  func.func @transform_6(%arg0: i32) -> (i32, i32) {
    %c0_i32 = arith.constant 0 : i32
    %c0_i32_0 = arith.constant 0 : i32
    %c0_i32_1 = arith.constant 0 : i32
    return %c0_i32, %c0_i32_0 : i32, i32
  }
  func.func @transform_7(%arg0: i32) -> (i32, i32) {
    %c0_i32 = arith.constant 0 : i32
    %c0_i32_0 = arith.constant 0 : i32
    %c0_i32_1 = arith.constant 0 : i32
    return %c0_i32, %c0_i32_0 : i32, i32
  }
  func.func @transform_8(%arg0: i32) -> (i32, i32, i32) {
    %c0_i32 = arith.constant 0 : i32
    %c0_i32_0 = arith.constant 0 : i32
    %c0_i32_1 = arith.constant 0 : i32
    return %arg0, %c0_i32, %c0_i32_0 : i32, i32, i32
  }
}

</mosaic_0001>

<bundles_post_ra>
// kernel: residual_block.1
= control target key start
LH: loop header
LB: loop body
LE: loop exit
PB: predicated region body
PF: predicated region fallthrough
CT: control target
= control target key end

     0   :  { %s2869_s27 = smov 0   ;;  %s3332_s0 = inlined_call_operand.vmem [shape: f32[2,4,256], index: 0, kind: input, shape index: {}]   ;;  %s3333_s1 = inlined_call_operand.vmem [shape: f32[1,384], index: 1, kind: input, shape index: {}]   ;;  %s3334_s2 = inlined_call_operand.vmem [shape: f32[9,4,4], index: 2, kind: input, shape index: {}]   ;;  %s3335_s3 = inlined_call_operand.vmem [shape: f32[4,1], index: 3, kind: input, shape index: {}]   ;;  %s3336_s4 = inlined_call_operand.vmem [shape: f32[4,1], index: 4, kind: input, shape index: {}]   ;;  %s3337_s5 = inlined_call_operand.vmem [shape: f32[9,4,4], index: 5, kind: input, shape index: {}]   ;;  %s3338_s6 = inlined_call_operand.vmem [shape: f32[4,1], index: 6, kind: input, shape index: {}]   ;;  %s3339_s7 = inlined_call_operand.vmem [shape: f32[4,1], index: 7, kind: input, shape index: {}]   ;;  %s3340_s8 = inlined_call_operand.vmem [shape: f32[2,4,256], index: 8, kind: output, shape index: {}]  }
   0x1 LB: > { %s2552_s28 = sadd.s32 4294967295, %s2766_s27   ;;  %p2556_p0 = scmp.ge.s32.totalorder %s2766_s27, 1  ;;  %s2766_s27 = sphi %s2869_s27, %s18_s27  }
   0x2   : > { %p262_p1 = scmp.lt.s32.totalorder %s2766_s27, 3 }
   0x4   : > { %p263_p2 = pnand %p2556_p0, %p262_p1 }
   0x5   : > { %p296_p3 = scmp.lt.s32.totalorder (!%p263_p2), %s2552_s28, 1  ;;  %s2768_s11 = smov (!%p263_p2), 19  }
   0x6   : > { %266 = sbr.rel (%p263_p2) target bundleno = 1539 (0x603), region = 52  ;;  %s2769_s12 = smov (!%p263_p2), 23  }
   0x7   : > { %s2770_s13 = smov (!%p263_p2), 31   ;;  %s2771_s14 = smov (!%p263_p2), 21  }
   0x8   : > { %s2772_s15 = smov (!%p263_p2), 25   ;;  %s2774_s16 = smov (!%p263_p2), 27  }
   0x9   : > { %s2775_s17 = smov (!%p263_p2), 29   ;;  %s2776_s18 = smov (!%p263_p2), 33  }
   0xa   : > { %s2777_s19 = smov (!%p263_p2), 35   ;;  %s2778_s20 = smov (!%p263_p2), 37  }
   0xb   : > { %s3348_s28 = smov (!%p296_p3, %s2552_s28), 1  ;;  %v2773_v6 = vmov 0.0   ;;  %s2779_s21 = smov 39   ;;  %vm315_vm0 = vcmask 281752   ;;  %vm322_vm1 = vcmask 429352   ;;  %vm329_vm2 = vcmask 576952  }
   0xc   : > { %s2687_s29 = sshll.u32 %s3348_s28, 3  ;;  %308 = vst [vmem:[#allocation2] sm:$0xff] %v2773_v6  ;;  %s2780_s22 = smov 45   ;;  %vm336_vm3 = vcmask 724552   ;;  %vm343_vm4 = vcmask 872152   ;;  %vm360_vm5 = vcmask 1044472  }
   0xd   : > { %s2885_s10 = scalar_lea.vmem %s3332_s0, %s2687_s29  ;;  %309 = vst [vmem:[#allocation2 + $0x8] sm:$0xff] %v2773_v6  ;;  %s2781_s23 = smov 41   ;;  %vm361_vm6 = vcmask 121860   ;;  %vm357_vm7 = vcmask 252928   ;;  %vm350_vm8 = vcmask 1019752   ;;  %vm369_vm10 = vcmask 265352  }
   0xe   : > { %v310_v0 = vld [vmem:[%s2885_s10] sm:$0xf]  ;;  %1361 = vst [vmem:[#allocation3] sm:$0xf] %v2773_v6  ;;  %v371_v9 = vld [vmem:[%s2885_s10 + $0x4] sm:$0xf]  ;;  %vm362_vm9 = vmor %vm361_vm6, %vm360_vm5 }
   0xf   : > { %v324_v1 = vld [vmem:[%s2885_s10] sm:$0xf]  ;;  %312 = vrot.lane.b32.xlu0 %v310_v0, %s2768_s11  ;;  %1362 = vst [vmem:[#allocation3 + $0x10] sm:$0xf] %v2773_v6  ;;  %v378_v10 = vld [vmem:[%s2885_s10 + $0x4] sm:$0xf] }
  0x10   : > { %326 = vrot.lane.b32.xlu1 %v324_v1, %s2769_s12  ;;  %v352_v2 = vld [vmem:[%s2885_s10] sm:$0xf]  ;;  %v385_v11 = vld [vmem:[%s2885_s10 + $0x4] sm:$0xf]  ;;  %s2782_s24 = smov 43   ;;  %s2783_s25 = smov 47  }
  0x11   : > { %354 = vrot.lane.b32.xlu2 %v352_v2, %s2770_s13  ;;  %v317_v3 = vld [vmem:[%s2885_s10] sm:$0xf]  ;;  %v406_v12 = vld [vmem:[%s2885_s10 + $0x4] sm:$0xf]  ;;  %s2784_s26 = smov 49   ;;  %vm376_vm11 = vcmask 412952  }
  0x12   : > { %v331_v4 = vld [vmem:[%s2885_s10] sm:$0xf]  ;;  %v392_v13 = vld [vmem:[%s2885_s10 + $0x4] sm:$0xf]  ;;  %vm383_vm12 = vcmask 560552   ;;  %vm390_vm13 = vcmask 708152  }
  0x13   : > { %v338_v5 = vld [vmem:[%s2885_s10] sm:$0xf]  ;;  %v399_v14 = vld [vmem:[%s2885_s10 + $0x4] sm:$0xf]  ;;  %vm414_vm14 = vcmask 1044456   ;;  %vm415_vm15 = vcmask 105476  }
  0x14   : > { %v345_v7 = vld [vmem:[%s2885_s10] sm:$0xf]  ;;  %v418_v15 = vld [vmem:[%s2885_s10 + $0x4] sm:$0xf]  ;;  %vm430_vm5 = vcmask 396552   ;;  %s2785_s30 = smov 127  }
  0x15   : > { %v364_v8 = vld [vmem:[%s2885_s10] sm:$0xf]  ;;  %v425_v16 = vld [vmem:[%s2885_s10 + $0x4] sm:$0xf]  ;;  %vm464_vm6 = vcmask 1043456   ;;  %s2786_s9 = smov 126  }
  0x16   : > { %s2787_s12 = smov 110   ;;  %s2788_s13 = smov 109  }
  0x17   : > { %319 = vrot.lane.b32.xlu0 %v317_v3, %s2771_s14  ;;  %s2789_s14 = smov 108   ;;  %s2814_s28 = smov 124  }
  0x18   : > { %333 = vrot.lane.b32.xlu1 %v331_v4, %s2772_s15  ;;  %s2790_s15 = smov 92  }
  0x19   : > { %340 = vrot.lane.b32.xlu2 %v338_v5, %s2774_s16  ;;  %s2791_s16 = smov 91  }
  0x1f   : > { %347 = vrot.lane.b32.xlu0 %v345_v7, %s2775_s17  ;;  %s2792_s17 = smov 90  }
  0x20   : > { %366 = vrot.lane.b32.xlu1 %v364_v8, %s2776_s18  ;;  %s2794_s18 = smov 18  }
  0x21   : > { %373 = vrot.lane.b32.xlu2 %v371_v9, %s2777_s19  ;;  %s2795_s19 = smov 17  }
  0x27   : > { %380 = vrot.lane.b32.xlu0 %v378_v10, %s2778_s20  ;;  %s2796_s20 = smov 1  }
  0x28   : > { %387 = vrot.lane.b32.xlu1 %v385_v11, %s2779_s21  ;;  %s2797_s21 = smov 111  }
  0x29   : > { %408 = vrot.lane.b32.xlu2 %v406_v12, %s2780_s22  ;;  %s2808_s22 = smov 6  }
  0x2f   : > { %394 = vrot.lane.b32.xlu0 %v392_v13, %s2781_s23  ;;  %v432_v13 = vld [vmem:[%s3334_s2] sm:$0xf] }
  0x30   : > { %401 = vrot.lane.b32.xlu1 %v399_v14, %s2782_s24  ;;  %s2810_s24 = smov 24  }
  0x31   : > { %420 = vrot.lane.b32.xlu2 %v418_v15, %s2783_s25  ;;  %s2798_s25 = smov 2  }
  0x37   : > { %427 = vrot.lane.b32.xlu0 %v425_v16, %s2784_s26  ;;  %s2799_s26 = smov 14  }
  0x6b   : > { %v355_v17 = vpop.permute.xlu2 %354 }
  0x6c   : > { %v356_v23 = vrot.slane %v355_v17, 4 }
  0x6e   : > { %v358_v27 = vsel %vm357_vm7, %v356_v23, %v355_v17  ;;  %vm460_vm7 = vcmask 31744  }
  0x73   : > { %v341_v20 = vpop.permute.xlu2 %340 }
  0x7b   : > { %v374_v24 = vpop.permute.xlu2 %373 }
  0x81   : > { %v313_v18 = vpop.permute.xlu0 %312 }
  0x82   : > { %v327_v19 = vpop.permute.xlu1 %326  ;;  %316 = vst.msk [vmem:[#allocation2] sm:$0xf] %vm315_vm0, %v313_v18  ;;  %vm397_vm0 = vcmask 855752   ;;  %v2561_v18 = vld [vmem:[%s3334_s2 + $0x4] sm:$0xf] }
  0x83   : > { %v409_v30 = vpop.permute.xlu2 %408 }
  0x84   : > { %v410_v31 = vrot.slane %v409_v30, 4 }
  0x89   : > { %v320_v21 = vpop.permute.xlu0 %319 }
  0x8a   : > { %v334_v22 = vpop.permute.xlu1 %333  ;;  %323 = vst.msk [vmem:[#allocation2] sm:$0xf] %vm322_vm1, %v320_v21  ;;  %vm411_vm1 = vcmask 367616  }
  0x8b   : > { %330 = vst.msk [vmem:[#allocation2] sm:$0xf] %vm329_vm2, %v327_v19  ;;  %vm404_vm2 = vcmask 1003352   ;;  %v421_v34 = vpop.permute.xlu2 %420  ;;  %v412_v35 = vsel %vm411_vm1, %v410_v31, %v409_v30  ;;  %v2581_v31 = vld [vmem:[%s3334_s2 + $0xc] sm:$0xf] }
  0x8c   : > { %337 = vst.msk [vmem:[#allocation2] sm:$0xf] %vm336_vm3, %v334_v22  ;;  %vm416_vm3 = vmor %vm415_vm15, %vm414_vm14  ;;  %vm1114_vm14 = vcmask 744448   ;;  %vm1211_vm15 = vcmask 736256  }
  0x8d   : > { %344 = vst.msk [vmem:[#allocation2] sm:$0xf] %vm343_vm4, %v341_v20  ;;  %vm423_vm4 = vcmask 248952  }
  0x91   : > { %v348_v25 = vpop.permute.xlu0 %347 }
  0x92   : > { %v367_v26 = vpop.permute.xlu1 %366  ;;  %351 = vst.msk [vmem:[#allocation2] sm:$0xf] %vm350_vm8, %v348_v25  ;;  %vm456_vm8 = vcmask 1039360   ;;  %v2574_v25 = vld [vmem:[%s3334_s2 + $0x8] sm:$0xf] }
  0x93   : > { %363 = vst.msk [vmem:[#allocation2] sm:$0xff] %vm362_vm9, %v358_v27  ;;  %vm726_vm9 = vcmask 900096  }
  0x94   : > { %370 = vst.msk [vmem:[#allocation2 + $0x4] sm:$0xf] %vm369_vm10, %v367_v26  ;;  %vm629_vm10 = vcmask 1031168  }
  0x95   : > { %377 = vst.msk [vmem:[#allocation2 + $0x4] sm:$0xf] %vm376_vm11, %v374_v24  ;;  %vm823_vm11 = vcmask 891904  }
  0x99   : > { %v381_v28 = vpop.permute.xlu0 %380 }
  0x9a   : > { %v388_v29 = vpop.permute.xlu1 %387  ;;  %384 = vst.msk [vmem:[#allocation2 + $0x4] sm:$0xf] %vm383_vm12, %v381_v28  ;;  %vm920_vm12 = vcmask 883712  }
  0x9b   : > { %391 = vst.msk [vmem:[#allocation2 + $0x4] sm:$0xf] %vm390_vm13, %v388_v29  ;;  %vm1017_vm13 = vcmask 752640  }
  0xa1   : > { %v395_v32 = vpop.permute.xlu0 %394 }
  0xa2   : > { %v402_v33 = vpop.permute.xlu1 %401  ;;  %398 = vst.msk [vmem:[#allocation2 + $0x4] sm:$0xf] %vm397_vm0, %v395_v32 }
  0xa3   : > { %405 = vst.msk [vmem:[#allocation2 + $0x4] sm:$0xf] %vm404_vm2, %v402_v33 }
  0xa4   : > { %417 = vst.msk [vmem:[#allocation2 + $0x4] sm:$0xff] %vm416_vm3, %v412_v35 }
  0xa5   : > { %424 = vst.msk [vmem:[#allocation2 + $0x8] sm:$0xf] %vm423_vm4, %v421_v34 }
  0xa9   : > { %v428_v36 = vpop.permute.xlu0 %427 }
  0xaa   : > { %431 = vst.msk [vmem:[#allocation2 + $0x8] sm:$0xf] %vm430_vm5, %v428_v36 }
  0xab   : > { %v2904_v37 = vld [vmem:[#allocation2] sm:$0xff] }
  0xac   : > { %441 = vst [vmem:[#allocation1] ss:$2 sm:$0xff] %v2904_v37 }
  0xb1   : > { %v2907_v38 = vld [vmem:[#allocation2 + $0x8] sm:$0xff] }
  0xb2   : > { %443 = vst [vmem:[#allocation1 + $0x10] ss:$2 sm:$0xff] %v2907_v38  ;;  %v434_v41 = vld [vmem:[#allocation2 + $0x8] sm:$0xf] }
  0xb3   : > { %v444_v39 = vld.sshfl [vmem:[#allocation1] sm:$0xff pattern:$0x75316420]  ;;  %v445_v40 = vld.sshfl [vmem:[#allocation1 + $0x8] sm:$0xff pattern:$0x75316420] }
  0xb4   : > { %533 = vst [vmem:[#allocation1] ss:$2 sm:$0xff] %v2904_v37  ;;  %450 = vrot.lane.b32.xlu1 %v445_v40, %s2785_s30  ;;  %448 = vrot.lane.b32.xlu0 %v444_v39, %s2785_s30 }
  0xb9   : > { %v446_v42 = vld.sshfl [vmem:[#allocation1 + $0x10] sm:$0xff pattern:$0x75316420]  ;;  %v447_v43 = vld.sshfl [vmem:[#allocation1 + $0x18] sm:$0xff pattern:$0x75316420] }
  0xba   : > { %535 = vst [vmem:[#allocation1 + $0x10] ss:$2 sm:$0xff] %v434_v41  ;;  %454 = vrot.lane.b32.xlu2 %v447_v43, %s2785_s30 }
  0xbb   : > { %v536_v44 = vld.sshfl [vmem:[#allocation1] sm:$0xff pattern:$0x75316420]  ;;  %v2914_v45 = vld.sshfl [vmem:[#allocation1 + $0x8] sm:$0xff pattern:$0x75316420] }
  0xbc   : > { %614 = vst [vmem:[#allocation1] ss:$2 sm:$0xff] %v2904_v37  ;;  %2568 = vmatpush.msk.msra.mxu3 %vm464_vm6, %v536_v44  ;;  %452 = vrot.lane.b32.xlu1 %v446_v42, %s2785_s30 }
  0xbd   : > { %2569 = vmatmul.msk.f32.vlgmr.msra.gmra.mxu3 %vm460_vm7, %v432_v13 }
  0xc1   : > { %v2919_v46 = vld.sshfl [vmem:[#allocation1 + $0x10] sm:$0xff pattern:$0x75316420] }
  0xc2   : > { %616 = vst [vmem:[#allocation1 + $0x10] ss:$2 sm:$0xff] %v2907_v38 }
  0xc3   : > { %v617_v47 = vld.sshfl [vmem:[#allocation1] sm:$0xff pattern:$0x75316420]  ;;  %v618_v48 = vld.sshfl [vmem:[#allocation1 + $0x8] sm:$0xff pattern:$0x75316420] }
  0xc4   : > { %711 = vst [vmem:[#allocation1] ss:$2 sm:$0xff] %v2904_v37  ;;  %623 = vrot.lane.b32.xlu0 %v618_v48, %s2786_s9  ;;  %621 = vrot.lane.b32.xlu2 %v617_v47, %s2786_s9 }
  0xc9   : > { %v619_v49 = vld.sshfl [vmem:[#allocation1 + $0x10] sm:$0xff pattern:$0x75316420]  ;;  %v620_v50 = vld.sshfl [vmem:[#allocation1 + $0x18] sm:$0xff pattern:$0x75316420] }
  0xca   : > { %713 = vst [vmem:[#allocation1 + $0x10] ss:$2 sm:$0xff] %v2907_v38  ;;  %625 = vrot.lane.b32.xlu1 %v619_v49, %s2786_s9  ;;  %v2595_v49 = vld [vmem:[%s3334_s2 + $0x14] sm:$0xf] }
  0xcb   : > { %v714_v51 = vld.sshfl [vmem:[#allocation1] sm:$0xff pattern:$0x75316420]  ;;  %v715_v52 = vld.sshfl [vmem:[#allocation1 + $0x8] sm:$0xff pattern:$0x75316420] }
  0xcc   : > { %808 = vst [vmem:[#allocation1] ss:$2 sm:$0xff] %v2904_v37  ;;  %720 = vrot.lane.b32.xlu2 %v715_v52, %s2787_s12 }
  0xd1   : > { %v716_v53 = vld.sshfl [vmem:[#allocation1 + $0x10] sm:$0xff pattern:$0x75316420]  ;;  %v717_v54 = vld.sshfl [vmem:[#allocation1 + $0x18] sm:$0xff pattern:$0x75316420] }
  0xd2   : > { %810 = vst [vmem:[#allocation1 + $0x10] ss:$2 sm:$0xff] %v2907_v38  ;;  %627 = vrot.lane.b32.xlu1 %v620_v50, %s2786_s9  ;;  %722 = vrot.lane.b32.xlu0 %v716_v53, %s2787_s12 }
  0xd3   : > { %v811_v55 = vld.sshfl [vmem:[#allocation1] sm:$0xff pattern:$0x75316420]  ;;  %v812_v56 = vld.sshfl [vmem:[#allocation1 + $0x8] sm:$0xff pattern:$0x75316420] }
  0xd4   : > { %905 = vst [vmem:[#allocation1] ss:$2 sm:$0xff] %v2904_v37  ;;  %718 = vrot.lane.b32.xlu2 %v714_v51, %s2787_s12 }
  0xd9   : > { %v814_v57 = vld.sshfl [vmem:[#allocation1 + $0x18] sm:$0xff pattern:$0x75316420]  ;;  %v813_v58 = vld.sshfl [vmem:[#allocation1 + $0x10] sm:$0xff pattern:$0x75316420] }
  0xda   : > { %817 = vrot.lane.b32.xlu1 %v812_v56, %s2788_s13  ;;  %724 = vrot.lane.b32.xlu0 %v717_v54, %s2787_s12  ;;  %907 = vst [vmem:[#allocation1 + $0x10] ss:$2 sm:$0xff] %v2907_v38 }
  0xdb   : > { %v908_v59 = vld.sshfl [vmem:[#allocation1] sm:$0xff pattern:$0x75316420]  ;;  %v909_v60 = vld.sshfl [vmem:[#allocation1 + $0x8] sm:$0xff pattern:$0x75316420] }
  0xdc   : > { %1002 = vst [vmem:[#allocation1] ss:$2 sm:$0xff] %v2904_v37  ;;  %821 = vrot.lane.b32.xlu2 %v814_v57, %s2788_s13 }
  0xe1   : > { %v911_v61 = vld.sshfl [vmem:[#allocation1 + $0x18] sm:$0xff pattern:$0x75316420]  ;;  %v910_v62 = vld.sshfl [vmem:[#allocation1 + $0x10] sm:$0xff pattern:$0x75316420] }
  0xe2   : > { %815 = vrot.lane.b32.xlu0 %v811_v55, %s2788_s13  ;;  %819 = vrot.lane.b32.xlu1 %v813_v58, %s2788_s13  ;;  %1004 = vst [vmem:[#allocation1 + $0x10] ss:$2 sm:$0xff] %v2907_v38  ;;  %v2602_v58 = vld [vmem:[%s3334_s2 + $0x18] sm:$0xf] }
  0xe3   : > { %v1005_v63 = vld.sshfl [vmem:[#allocation1] sm:$0xff pattern:$0x75316420]  ;;  %v1006_v0 = vld.sshfl [vmem:[#allocation1 + $0x8] sm:$0xff pattern:$0x75316420] }
  0xe4   : > { %1099 = vst [vmem:[#allocation1] ss:$2 sm:$0xff] %v2904_v37  ;;  %912 = vrot.lane.b32.xlu2 %v908_v59, %s2789_s14 }
  0xe9   : > { %v1007_v1 = vld.sshfl [vmem:[#allocation1 + $0x10] sm:$0xff pattern:$0x75316420]  ;;  %v1008_v2 = vld.sshfl [vmem:[#allocation1 + $0x18] sm:$0xff pattern:$0x75316420] }
  0xea   : > { %914 = vrot.lane.b32.xlu0 %v909_v60, %s2789_s14  ;;  %918 = vrot.lane.b32.xlu1 %v911_v61, %s2789_s14  ;;  %1101 = vst [vmem:[#allocation1 + $0x10] ss:$2 sm:$0xff] %v2907_v38 }
  0xeb   : > { %v1102_v3 = vld.sshfl [vmem:[#allocation1] sm:$0xff pattern:$0x75316420]  ;;  %v1103_v4 = vld.sshfl [vmem:[#allocation1 + $0x8] sm:$0xff pattern:$0x75316420] }
  0xec   : > { %1196 = vst [vmem:[#allocation1] ss:$2 sm:$0xff] %v2904_v37  ;;  %1011 = vrot.lane.b32.xlu2 %v1006_v0, %s2790_s15  ;;  %v2609_v0 = vld [vmem:[%s3334_s2 + $0x1c] sm:$0xf] }
  0xf1   : > { %v1104_v5 = vld.sshfl [vmem:[#allocation1 + $0x10] sm:$0xff pattern:$0x75316420]  ;;  %v1105_v6 = vld.sshfl [vmem:[#allocation1 + $0x18] sm:$0xff pattern:$0x75316420] }
  0xf2   : > { %1009 = vrot.lane.b32.xlu1 %v1005_v63, %s2790_s15  ;;  %916 = vrot.lane.b32.xlu0 %v910_v62, %s2789_s14  ;;  %1198 = vst [vmem:[#allocation1 + $0x10] ss:$2 sm:$0xff] %v2907_v38 }
  0xf3   : > { %v1199_v8 = vld.sshfl [vmem:[#allocation1] sm:$0xff pattern:$0x75316420]  ;;  %v1200_v10 = vld.sshfl [vmem:[#allocation1 + $0x8] sm:$0xff pattern:$0x75316420] }
  0xf4   : > { %1013 = vrot.lane.b32.xlu2 %v1007_v1, %s2790_s15 }
  0xf9   : > { %v1201_v7 = vld.sshfl [vmem:[#allocation1 + $0x10] sm:$0xff pattern:$0x75316420]  ;;  %v1202_v9 = vld.sshfl [vmem:[#allocation1 + $0x18] sm:$0xff pattern:$0x75316420] }
  0xfa   : > { %1108 = vrot.lane.b32.xlu0 %v1103_v4, %s2791_s16  ;;  %1110 = vrot.lane.b32.xlu1 %v1104_v5, %s2791_s16 }
  0xfc   : > { %1015 = vrot.lane.b32.xlu2 %v1008_v2, %s2790_s15  ;;  %s2800_s15 = smov 16  }
 0x102   : > { %1106 = vrot.lane.b32.xlu0 %v1102_v3, %s2791_s16  ;;  %1112 = vrot.lane.b32.xlu1 %v1105_v6, %s2791_s16  ;;  %s2801_s16 = smov 8  }
 0x104   : > { %1207 = vrot.lane.b32.xlu2 %v1201_v7, %s2792_s17 }
 0x10a   : > { %1203 = vrot.lane.b32.xlu1 %v1199_v8, %s2792_s17  ;;  %1209 = vrot.lane.b32.xlu0 %v1202_v9, %s2792_s17  ;;  %v2616_v9 = vld [vmem:[%s3334_s2 + $0x20] sm:$0xf] }
 0x10c   : > { %1205 = vrot.lane.b32.xlu2 %v1200_v10, %s2792_s17  ;;  %s2802_s17 = smov 22  }
 0x114   : > { %v455_v11 = vpop.permute.xlu2 %454 }
 0x11e   : > { %v622_v12 = vpop.permute.xlu2 %621 }
 0x126   : > { %v451_v14 = vpop.permute.xlu1 %450  ;;  %v721_v15 = vpop.permute.xlu2 %720 }
 0x127   : > { %v449_v16 = vpop.permute.xlu0 %448 }
 0x128   : > { %v457_v17 = vsel %vm456_vm8, %v449_v16, %v451_v14 }
 0x129   : > { %2562 = vmatpush.msk.msra.mxu0 %vm464_vm6, %v457_v17 }
 0x12a   : > { %2563 = vmatmul.msk.f32.vlgmr.msra.gmra.mxu0 %vm460_vm7, %v2561_v18 }
 0x12b   : > { %2570 = vmatpush.msk.msrb.mxu0 %vm464_vm6, %v2914_v45 }
 0x12e   : > { %v719_v19 = vpop.permute.xlu2 %718  ;;  %v453_v20 = vpop.permute.xlu1 %452 }
 0x12f   : > { %v458_v21 = vsel %vm456_vm8, %v451_v14, %v453_v20  ;;  %v459_v22 = vsel %vm456_vm8, %v453_v20, %v455_v11  ;;  %v727_v23 = vsel %vm726_vm9, %v719_v19, %v721_v15 }
 0x130   : > { %2564 = vmatpush.msk.msra.mxu1 %vm464_vm6, %v458_v21  ;;  %2566 = vmatpush.msk.msra.mxu2 %vm464_vm6, %v459_v22 }
 0x131   : > { %2567 = vmatmul.msk.f32.vlgmr.msra.gmra.mxu2 %vm460_vm7, %v2561_v18  ;;  %2565 = vmatmul.msk.f32.vlgmr.msra.gmra.mxu1 %vm460_vm7, %v2561_v18 }
 0x132   : > { %2572 = vmatpush.msk.msrb.mxu1 %vm464_vm6, %v2919_v46  ;;  %2571 = vmatmul.msk.f32.vlgmr.msrb.gmra.mxu0 %vm460_vm7, %v432_v13  ;;  %v2588_v46 = vld [vmem:[%s3334_s2 + $0x10] sm:$0xf] }
 0x134   : > { %2582 = vmatpush.msk.msra.mxu1 %vm464_vm6, %v727_v23  ;;  %v2793_v23 = vmov 0  }
 0x135   : > { %2753 = vset.pattern.permute.xlu2 %v2793_v23  ;;  %2754 = vset.pattern.permute.xlu1 %v2793_v23 }
 0x136   : > { %v624_v24 = vpop.permute.xlu0 %623  ;;  %v822_v26 = vpop.permute.xlu2 %821  ;;  %2755 = vset.pattern.permute.xlu0 %v2793_v23 }
 0x137   : > { %v630_v27 = vsel %vm629_vm10, %v622_v12, %v624_v24 }
 0x138   : > { %2575 = vmatpush.msk.msrb.mxu2 %vm464_vm6, %v630_v27 }
 0x139   : > { %2576 = vmatmul.msk.f32.vlgmr.msrb.gmra.mxu2 %vm460_vm7, %v2574_v25  ;;  %2573 = vmatmul.msk.f32.vlgmr.msrb.gmra.mxu1 %vm460_vm7, %v432_v13 }
 0x13c   : > { %v626_v28 = vpop.permute.xlu1 %625 }
 0x13d   : > { %v631_v29 = vsel %vm629_vm10, %v624_v24, %v626_v28 }
 0x13e   : > { %2577 = vmatpush.msk.msrb.mxu3 %vm464_vm6, %v631_v29  ;;  %v913_v30 = vpop.permute.xlu2 %912 }
 0x13f   : > { %2578 = vmatmul.msk.f32.vlgmr.msrb.gmra.mxu3 %vm460_vm7, %v2574_v25 }
 0x140   : > { %v565_v16 = vpop.f32.mrf.mxu3 }
 0x141   : > { %2583 = vmatmul.msk.f32.vlgmr.msra.gmra.mxu1 %vm460_vm7, %v2581_v31 }
 0x144   : > { %v628_v32 = vpop.permute.xlu1 %627  ;;  %v723_v33 = vpop.permute.xlu0 %722 }
 0x145   : > { %v632_v34 = vsel %vm629_vm10, %v626_v28, %v628_v32  ;;  %v728_v35 = vsel %vm726_vm9, %v721_v15, %v723_v33 }
 0x146   : > { %2579 = vmatpush.msk.msra.mxu0 %vm464_vm6, %v632_v34  ;;  %2584 = vmatpush.msk.msra.mxu2 %vm464_vm6, %v728_v35  ;;  %v1012_v36 = vpop.permute.xlu2 %1011 }
 0x147   : > { %2585 = vmatmul.msk.f32.vlgmr.msra.gmra.mxu2 %vm460_vm7, %v2581_v31  ;;  %2580 = vmatmul.msk.f32.vlgmr.msra.gmra.mxu0 %vm460_vm7, %v2574_v25 }
 0x14c   : > { %v818_v37 = vpop.permute.xlu1 %817  ;;  %v725_v38 = vpop.permute.xlu0 %724 }
 0x14d   : > { %v729_v39 = vsel %vm726_vm9, %v723_v33, %v725_v38 }
 0x14e   : > { %2586 = vmatpush.msk.msra.mxu3 %vm464_vm6, %v729_v39  ;;  %v1014_v42 = vpop.permute.xlu2 %1013 }
 0x14f   : > { %2587 = vmatmul.msk.f32.vlgmr.msra.gmra.mxu3 %vm460_vm7, %v2581_v31  ;;  %v1019_v51 = vsel %vm1017_vm13, %v1012_v36, %v1014_v42 }
 0x154   : > { %v820_v40 = vpop.permute.xlu1 %819  ;;  %v816_v41 = vpop.permute.xlu0 %815 }
 0x155   : > { %v825_v43 = vsel %vm823_vm11, %v818_v37, %v820_v40  ;;  %v826_v44 = vsel %vm823_vm11, %v820_v40, %v822_v26  ;;  %v824_v45 = vsel %vm823_vm11, %v816_v41, %v818_v37 }
 0x156   : > { %2589 = vmatpush.msk.msrb.mxu0 %vm464_vm6, %v824_v45  ;;  %2591 = vmatpush.msk.msrb.mxu1 %vm464_vm6, %v825_v43  ;;  %v1016_v52 = vpop.permute.xlu2 %1015 }
 0x157   : > { %2593 = vmatpush.msk.msrb.mxu2 %vm464_vm6, %v826_v44  ;;  %2590 = vmatmul.msk.f32.vlgmr.msrb.gmra.mxu0 %vm460_vm7, %v2588_v46  ;;  %v1020_v59 = vsel %vm1017_vm13, %v1014_v42, %v1016_v52 }
 0x158   : > { %2594 = vmatmul.msk.f32.vlgmr.msrb.gmra.mxu2 %vm460_vm7, %v2588_v46  ;;  %2592 = vmatmul.msk.f32.vlgmr.msrb.gmra.mxu1 %vm460_vm7, %v2588_v46 }
 0x15c   : > { %v919_v47 = vpop.permute.xlu1 %918  ;;  %v915_v48 = vpop.permute.xlu0 %914 }
 0x15d   : > { %v921_v50 = vsel %vm920_vm12, %v913_v30, %v915_v48 }
 0x15e   : > { %2596 = vmatpush.msk.msrb.mxu3 %vm464_vm6, %v921_v50  ;;  %v1208_v60 = vpop.permute.xlu2 %1207 }
 0x15f   : > { %2597 = vmatmul.msk.f32.vlgmr.msrb.gmra.mxu3 %vm460_vm7, %v2595_v49 }
 0x160   : > { %2605 = vmatpush.msk.msra.mxu3 %vm464_vm6, %v1019_v51 }
 0x164   : > { %v1010_v53 = vpop.permute.xlu1 %1009  ;;  %v917_v54 = vpop.permute.xlu0 %916 }
 0x165   : > { %v1018_v55 = vsel %vm1017_vm13, %v1010_v53, %v1012_v36  ;;  %v922_v56 = vsel %vm920_vm12, %v915_v48, %v917_v54  ;;  %v923_v57 = vsel %vm920_vm12, %v917_v54, %v919_v47  ;;  %v306_v36 = vld [vmem:[%s3333_s1] sm:$0x7]  ;;  %vm1392_vm12 = vcmask 146432  }
 0x166   : > { %2598 = vmatpush.msk.msra.mxu0 %vm464_vm6, %v922_v56  ;;  %2600 = vmatpush.msk.msra.mxu1 %vm464_vm6, %v923_v57  ;;  %v1206_v1 = vpop.permute.xlu2 %1205  ;;  %vm307_vm0 = vcmp.ne.f32.partialorder %v306_v36, 0.0  ;;  %vm1480_vm13 = vcmask 154624  }
 0x167   : > { %2603 = vmatpush.msk.msra.mxu2 %vm464_vm6, %v1018_v55  ;;  %2599 = vmatmul.msk.f32.vlgmr.msra.gmra.mxu0 %vm460_vm7, %v2595_v49  ;;  %v1213_v6 = vsel %vm1211_vm15, %v1206_v1, %v1208_v60  ;;  %v1289_v46 = vsel %vm307_vm0, 1, %v2793_v23  ;;  %vm1948_vm0 = vcmask 908288  }
 0x168   : > { %2601 = vmatmul.msk.f32.vlgmr.msra.gmra.mxu1 %vm460_vm7, %v2595_v49  ;;  %2604 = vmatmul.msk.f32.vlgmr.msra.gmra.mxu2 %vm460_vm7, %v2602_v58  ;;  %v1290_v52 = vperm.slane %v1289_v46, 0  ;;  %v1291_v53 = vperm.slane %v1289_v46, 1 }
 0x169   : > { %2606 = vmatmul.msk.f32.vlgmr.msra.gmra.mxu3 %vm460_vm7, %v2602_v58  ;;  %2607 = vmatpush.msk.msrb.mxu0 %vm464_vm6, %v1020_v59 }
 0x16a   : > { %vm3050_vm1 = vcmp.eq.s32.totalorder %v1290_v52, 1  ;;  %vm3054_vm2 = vcmp.eq.s32.totalorder %v1291_v53, 1 }
 0x16c   : > { %v1111_v61 = vpop.permute.xlu1 %1110  ;;  %v1109_v62 = vpop.permute.xlu0 %1108 }
 0x16d   : > { %v1116_v63 = vsel %vm1114_vm14, %v1109_v62, %v1111_v61 }
 0x16e   : > { %2612 = vmatpush.msk.msrb.mxu2 %vm464_vm6, %v1116_v63  ;;  %v2337_v63 = vld [vmem:[%s2885_s10] sm:$0xf] }
 0x16f   : > { %2608 = vmatmul.msk.f32.vlgmr.msrb.gmra.mxu0 %vm460_vm7, %v2602_v58 }
 0x170   : > { %2613 = vmatmul.msk.f32.vlgmr.msrb.gmra.mxu2 %vm460_vm7, %v2609_v0 }
 0x174   : > { %v1113_v2 = vpop.permute.xlu1 %1112  ;;  %v1107_v3 = vpop.permute.xlu0 %1106 }
 0x175   : > { %v1117_v4 = vsel %vm1114_vm14, %v1111_v61, %v1113_v2  ;;  %v1115_v5 = vsel %vm1114_vm14, %v1107_v3, %v1109_v62  ;;  %vm1574_vm14 = vcmask 138240  }
 0x176   : > { %2610 = vmatpush.msk.msrb.mxu1 %vm464_vm6, %v1115_v5  ;;  %2614 = vmatpush.msk.msrb.mxu3 %vm464_vm6, %v1117_v4  ;;  %v1292_v4 = vperm.slane %v1289_v46, 2 }
 0x177   : > { %2611 = vmatmul.msk.f32.vlgmr.msrb.gmra.mxu1 %vm460_vm7, %v2609_v0  ;;  %2615 = vmatmul.msk.f32.vlgmr.msrb.gmra.mxu3 %vm460_vm7, %v2609_v0 }
 0x178   : > { %2619 = vmatpush.msk.msra.mxu1 %vm464_vm6, %v1213_v6  ;;  %vm3066_vm3 = vcmp.eq.s32.totalorder %v1292_v4, 1 }
 0x17c   : > { %v1204_v7 = vpop.permute.xlu1 %1203  ;;  %v1210_v8 = vpop.permute.xlu0 %1209 }
 0x17d   : > { %v1212_v10 = vsel %vm1211_vm15, %v1204_v7, %v1206_v1  ;;  %v1214_v11 = vsel %vm1211_vm15, %v1208_v60, %v1210_v8  ;;  %vm1671_vm15 = vcmask 7168  }
 0x17e   : > { %2617 = vmatpush.msk.msra.mxu0 %vm464_vm6, %v1212_v10  ;;  %2621 = vmatpush.msk.msra.mxu2 %vm464_vm6, %v1214_v11 }
 0x17f   : > { %2618 = vmatmul.msk.f32.vlgmr.msra.gmra.mxu0 %vm460_vm7, %v2616_v9  ;;  %2620 = vmatmul.msk.f32.vlgmr.msra.gmra.mxu1 %vm460_vm7, %v2616_v9 }
 0x180   : > { %2622 = vmatmul.msk.f32.vlgmr.msra.gmra.mxu2 %vm460_vm7, %v2616_v9 }
 0x1a7   : > { %v488_v12 = vpop.f32.mrf.mxu0 }
 0x1a8   : > { %v566_v28 = vadd.f32 %v565_v16, %v488_v12  ;;  %v2351_v12 = vld [vmem:[%s2885_s10] sm:$0xf] }
 0x1ae   : > { %v508_v13 = vpop.f32.mrf.mxu1 }
 0x1af   : > { %v585_v15 = vpop.f32.mrf.mxu0 }
 0x1b0   : > { %v586_v29 = vadd.f32 %v585_v15, %v508_v13 }
 0x1b4   : > { %v528_v14 = vpop.f32.mrf.mxu2 }
 0x1b6   : > { %v605_v17 = vpop.f32.mrf.mxu1 }
 0x1b7   : > { %v606_v39 = vadd.f32 %v605_v17, %v528_v14 }
 0x1bc   : > { %v659_v18 = vpop.f32.mrf.mxu2 }
 0x1bd   : > { %v702_v33 = vadd.f32 %v659_v18, %v566_v28 }
 0x1be   : > { %v756_v21 = vpop.f32.mrf.mxu1 }
 0x1bf   : > { %v799_v37 = vadd.f32 %v756_v21, %v702_v33 }
 0x1c2   : > { %v679_v20 = vpop.f32.mrf.mxu3 }
 0x1c3   : > { %v703_v34 = vadd.f32 %v679_v20, %v586_v29 }
 0x1c4   : > { %v699_v19 = vpop.f32.mrf.mxu0 }
 0x1c5   : > { %v704_v44 = vadd.f32 %v699_v19, %v606_v39 }
 0x1ca   : > { %v776_v22 = vpop.f32.mrf.mxu2 }
 0x1cb   : > { %v800_v38 = vadd.f32 %v776_v22, %v703_v34 }
 0x1d2   : > { %v796_v25 = vpop.f32.mrf.mxu3 }
 0x1d3   : > { %v801_v54 = vadd.f32 %v796_v25, %v704_v44  ;;  %v1288_v44 = vld [vmem:[%s3336_s4] sm:$0xf] }
 0x1d4   : > { %v853_v24 = vpop.f32.mrf.mxu0 }
 0x1d5   : > { %v873_v26 = vpop.f32.mrf.mxu1  ;;  %v896_v42 = vadd.f32 %v853_v24, %v799_v37 }
 0x1d6   : > { %v897_v43 = vadd.f32 %v873_v26, %v800_v38 }
 0x1db   : > { %v893_v27 = vpop.f32.mrf.mxu2 }
 0x1dc   : > { %v898_v57 = vadd.f32 %v893_v27, %v801_v54 }
 0x1e2   : > { %v950_v31 = vpop.f32.mrf.mxu3 }
 0x1e3   : > { %v993_v47 = vadd.f32 %v950_v31, %v896_v42 }
 0x1e4   : > { %v970_v30 = vpop.f32.mrf.mxu0 }
 0x1e5   : > { %v990_v32 = vpop.f32.mrf.mxu1  ;;  %v994_v48 = vadd.f32 %v970_v30, %v897_v43 }
 0x1e6   : > { %v995_v0 = vadd.f32 %v990_v32, %v898_v57 }
 0x1eb   : > { %v1047_v35 = vpop.f32.mrf.mxu2 }
 0x1ec   : > { %v1087_v40 = vpop.f32.mrf.mxu0  ;;  %v1067_v45 = vpop.f32.mrf.mxu3  ;;  %v1090_v50 = vadd.f32 %v1047_v35, %v993_v47 }
 0x1ed   : > { %v1091_v51 = vadd.f32 %v1067_v45, %v994_v48  ;;  %v1092_v5 = vadd.f32 %v1087_v40, %v995_v0  ;;  %v1287_v40 = vld [vmem:[%s3335_s3] sm:$0xf] }
 0x1f3   : > { %v1164_v49 = vpop.f32.mrf.mxu2 }
 0x1f4   : > { %v1144_v41 = vpop.f32.mrf.mxu1  ;;  %v1188_v55 = vadd.f32 %v1164_v49, %v1091_v51 }
 0x1f5   : > { %v1187_v56 = vadd.f32 %v1144_v41, %v1090_v50 }
 0x1fa   : > { %v1184_v1 = vpop.f32.mrf.mxu3 }
 0x1fb   : > { %v1189_v8 = vadd.f32 %v1184_v1, %v1092_v5 }
 0x1fc   : > { %v1241_v58 = vpop.f32.mrf.mxu0  ;;  %v1261_v59 = vpop.f32.mrf.mxu1 }
 0x1fd   : > { %v1284_v60 = vadd.f32 %v1241_v58, %v1187_v56  ;;  %v1285_v62 = vadd.f32 %v1261_v59, %v1188_v55 }
 0x1ff   : > { %v1307_v2 = vmul.f32 %v1284_v60, %v1284_v60  ;;  %v1308_v3 = vmul.f32 %v1285_v62, %v1285_v62  ;;  %v1296_v6 = vsel %vm3050_vm1, %v1284_v60, 0.0  ;;  %v1297_v7 = vsel %vm3054_vm2, %v1285_v62, 0.0 }
 0x200   : > { %v1299_v13 = vsel %vm464_vm6, %v1296_v6, 0.0  ;;  %v1300_v14 = vsel %vm464_vm6, %v1297_v7, 0.0 }
 0x201   : > { %v1310_v9 = vsel %vm3050_vm1, %v1307_v2, 0.0  ;;  %v1311_v10 = vsel %vm3054_vm2, %v1308_v3, 0.0  ;;  %v1301_v20 = vadd.f32 %v1300_v14, %v1299_v13 }
 0x202   : > { %v1313_v16 = vsel %vm464_vm6, %v1310_v9, 0.0  ;;  %v1314_v17 = vsel %vm464_vm6, %v1311_v10, 0.0 }
 0x203   : > { %v1281_v11 = vpop.f32.mrf.mxu2  ;;  %v1315_v24 = vadd.f32 %v1314_v17, %v1313_v16 }
 0x204   : > { %v1286_v15 = vadd.f32 %v1281_v11, %v1189_v8 }
 0x206   : > { %v1309_v18 = vmul.f32 %v1286_v15, %v1286_v15  ;;  %v1298_v19 = vsel %vm3066_vm3, %v1286_v15, 0.0 }
 0x207   : > { %v1302_v21 = vsel %vm464_vm6, %v1298_v19, 0.0 }
 0x208   : > { %v1303_v22 = vadd.f32 %v1302_v21, %v1301_v20  ;;  %v1312_v23 = vsel %vm3066_vm3, %v1309_v18, 0.0 }
 0x209   : > { %v1316_v25 = vsel %vm464_vm6, %v1312_v23, 0.0 }
 0x20a   : > { %1304 = vadd.xlane.f32.xlu0 %v1303_v22  ;;  %v1317_v26 = vadd.f32 %v1316_v25, %v1315_v24 }
 0x20c   : > { %1318 = vadd.xlane.f32.xlu1 %v1317_v26 }
 0x27d   : > { %v1305_v27 = vpop.xlane.xlu0 %1304 }
 0x27e   : > { %v1306_v28 = vmul.f32 0.00390625, %v1305_v27 }
 0x27f   : > { %v1319_v29 = vpop.xlane.xlu1 %1318 }
 0x280   : > { %v1320_v30 = vmul.f32 0.00390625, %v1319_v29  ;;  %v1321_v31 = vmul.f32 %v1306_v28, %v1306_v28  ;;  %v1324_v46 = vsub.f32 %v1284_v60, %v1306_v28  ;;  %v1325_v47 = vsub.f32 %v1285_v62, %v1306_v28 }
 0x281   : > { %v1326_v48 = vsub.f32 %v1286_v15, %v1306_v28 }
 0x282   : > { %v1322_v32 = vsub.f32 %v1320_v30, %v1321_v31 }
 0x284   : > { %v1323_v33 = vmax.f32 %v1322_v32, 0.0 }
 0x286   : > { %v1327_v34 = vadd.f32 1e-05, %v1323_v33 }
 0x288   : > { %2756 = vrsqrt.f32 %v1327_v34  ;;  %vm1334_vm5 = vweird.f32 %v1327_v34 }
 0x28e   : > { %v2757_v35 = vpop.eup %2756 }
 0x28f   : > { %v1329_v36 = vmul.f32 %v2757_v35, %v1327_v34  ;;  %vm1335_vm4 = vweird.f32 %v2757_v35 }
 0x290   : > { %vm1336_vm10 = vmor %vm1334_vm5, %vm1335_vm4  ;;  %vm2349_vm4 = vcmask 781952   ;;  %vm2480_vm5 = vcmask 818176  }
 0x291   : > { %v1330_v37 = vmul.f32 %v2757_v35, %v1329_v36 }
 0x293   : > { %v1331_v38 = vmul.f32 0.5, %v1330_v37 }
 0x295   : > { %v1332_v39 = vsub.f32 1.5, %v1331_v38 }
 0x297   : > { %v1333_v41 = vmul.f32 %v2757_v35, %v1332_v39 }
 0x299   : > { %v1337_v42 = vsel %vm1336_vm10, %v2757_v35, %v1333_v41  ;;  %vm2363_vm10 = vcmask 913152  }
 0x29a   : > { %v1338_v43 = vmul.f32 %v1337_v42, %v1287_v40 }
 0x29c   : > { %1341 = vperm.xlu2 %2753, %v1338_v43   ;;  %v2623_v43 = vld [vmem:[%s3337_s5 + $0x4] sm:$0xf] }
 0x2a4   : > { %1349 = vperm.xlu2 %2753, %v1288_v44  }
 0x2f6   : > { %v1342_v45 = vpop.permute.xlu2 %1341 }
 0x2f7   : > { %v1344_v49 = vmul.f32 %v1342_v45, %v1324_v46  ;;  %v1345_v50 = vmul.f32 %v1342_v45, %v1325_v47  ;;  %v1346_v51 = vmul.f32 %v1342_v45, %v1326_v48 }
 0x2fe   : > { %v1350_v52 = vpop.permute.xlu2 %1349 }
 0x2ff   : > { %v1352_v53 = vadd.f32 %v1350_v52, %v1344_v49  ;;  %v1353_v54 = vadd.f32 %v1350_v52, %v1345_v50  ;;  %v1354_v55 = vadd.f32 %v1350_v52, %v1346_v51  ;;  %v1370_v52 = vld [vmem:[%s3337_s5] sm:$0xf] }
 0x301   : > { %v1355_v56 = vmax.f32 %v1352_v53, 0.0  ;;  %v1356_v57 = vmax.f32 %v1353_v54, 0.0  ;;  %v1357_v58 = vmax.f32 %v1354_v55, 0.0 }
 0x303   : > { %v1359_v59 = vsel %vm3054_vm2, %v1356_v57, 0.0  ;;  %v1360_v0 = vsel %vm3066_vm3, %v1357_v58, 0.0  ;;  %v1358_v60 = vsel %vm3050_vm1, %v1355_v56, 0.0 }
 0x304   : > { %v1365_v1 = vrot.slane %v1359_v59, 4  ;;  %1369 = vst [vmem:[#allocation3 + $0xc] sm:$0xf] %v1360_v0 }
 0x306   : > { %v3093_v62 = vsel %vm464_vm6, %v1358_v60, %v1365_v1 }
 0x307   : > { %1368 = vst [vmem:[#allocation3 + $0x4] sm:$0xff] %v3093_v62 }
 0x30b   : > { %v1750_v19 = vld [vmem:[#allocation3 + $0xc] sm:$0xf] }
 0x30c   : > { %v1834_v24 = vld [vmem:[#allocation3 + $0xc] sm:$0xff] }
 0x30e   : > { %v1371_v2 = vld [vmem:[#allocation3] sm:$0xff]  ;;  %v1372_v3 = vld [vmem:[#allocation3 + $0x8] sm:$0xff] }
 0x30f   : > { %1377 = vst [vmem:[#allocation1] ss:$2 sm:$0xff] %v1371_v2 }
 0x310   : > { %1379 = vst [vmem:[#allocation1 + $0x10] ss:$2 sm:$0xff] %v1372_v3 }
 0x316   : > { %v1380_v4 = vld.sshfl [vmem:[#allocation1] sm:$0xff pattern:$0x75316420]  ;;  %v1381_v5 = vld.sshfl [vmem:[#allocation1 + $0x8] sm:$0xff pattern:$0x75316420] }
 0x317   : > { %v1383_v6 = vld.sshfl [vmem:[#allocation1 + $0x18] sm:$0xff pattern:$0x75316420]  ;;  %1465 = vst [vmem:[#allocation1] ss:$2 sm:$0xff] %v1371_v2  ;;  %1384 = vrot.lane.b32.xlu2 %v1380_v4, %s2794_s18 }
 0x318   : > { %v1382_v7 = vld.sshfl [vmem:[#allocation1 + $0x10] sm:$0xff pattern:$0x75316420] }
 0x319   : > { %1467 = vst [vmem:[#allocation1 + $0x10] ss:$2 sm:$0xff] %v1372_v3 }
 0x31e   : > { %v1468_v8 = vld.sshfl [vmem:[#allocation1] sm:$0xff pattern:$0x75316420]  ;;  %v1469_v9 = vld.sshfl [vmem:[#allocation1 + $0x8] sm:$0xff pattern:$0x75316420] }
 0x31f   : > { %1559 = vst [vmem:[#allocation1] ss:$2 sm:$0xff] %v1371_v2  ;;  %1386 = vrot.lane.b32.xlu2 %v1381_v5, %s2794_s18  ;;  %1474 = vrot.lane.b32.xlu1 %v1469_v9, %s2768_s11 }
 0x320   : > { %1472 = vrot.lane.b32.xlu0 %v1468_v8, %s2768_s11  ;;  %v1470_v10 = vld.sshfl [vmem:[#allocation1 + $0x10] sm:$0xff pattern:$0x75316420]  ;;  %v1471_v11 = vld.sshfl [vmem:[#allocation1 + $0x18] sm:$0xff pattern:$0x75316420] }
 0x321   : > { %1561 = vst [vmem:[#allocation1 + $0x10] ss:$2 sm:$0xff] %v1372_v3  ;;  %v2643_v8 = vld [vmem:[%s3337_s5 + $0xc] sm:$0xf] }
 0x326   : > { %v1562_v13 = vld.sshfl [vmem:[#allocation1] sm:$0xff pattern:$0x75316420]  ;;  %v1563_v14 = vld.sshfl [vmem:[#allocation1 + $0x8] sm:$0xff pattern:$0x75316420] }
 0x327   : > { %1656 = vst [vmem:[#allocation1] ss:$2 sm:$0xff] %v1371_v2  ;;  %1388 = vrot.lane.b32.xlu2 %v1382_v7, %s2794_s18 }
 0x328   : > { %v1564_v15 = vld.sshfl [vmem:[#allocation1 + $0x10] sm:$0xff pattern:$0x75316420]  ;;  %1566 = vrot.lane.b32.xlu0 %v1562_v13, %s2795_s19  ;;  %v1565_v16 = vld.sshfl [vmem:[#allocation1 + $0x18] sm:$0xff pattern:$0x75316420] }
 0x329   : > { %1570 = vrot.lane.b32.xlu1 %v1564_v15, %s2795_s19  ;;  %1658 = vst [vmem:[#allocation1 + $0x10] ss:$2 sm:$0xff] %v1372_v3  ;;  %v2636_v3 = vld [vmem:[%s3337_s5 + $0x8] sm:$0xf] }
 0x32e   : > { %v1659_v17 = vld.sshfl [vmem:[#allocation1] sm:$0xff pattern:$0x75316420]  ;;  %v1660_v18 = vld.sshfl [vmem:[#allocation1 + $0x8] sm:$0xff pattern:$0x75316420] }
 0x32f   : > { %1753 = vst [vmem:[#allocation1] ss:$2 sm:$0xff] %v3093_v62  ;;  %1390 = vrot.lane.b32.xlu2 %v1383_v6, %s2794_s18 }
 0x330   : > { %v1662_v20 = vld.sshfl [vmem:[#allocation1 + $0x18] sm:$0xff pattern:$0x75316420]  ;;  %1572 = vrot.lane.b32.xlu0 %v1565_v16, %s2795_s19  ;;  %v1661_v21 = vld.sshfl [vmem:[#allocation1 + $0x10] sm:$0xff pattern:$0x75316420] }
 0x331   : > { %1665 = vrot.lane.b32.xlu1 %v1660_v18, %s2796_s20  ;;  %1755 = vst [vmem:[#allocation1 + $0x10] ss:$2 sm:$0xff] %v1750_v19  ;;  %v2657_v19 = vld [vmem:[%s3337_s5 + $0x14] sm:$0xf] }
 0x336   : > { %v3107_v22 = vld.sshfl [vmem:[#allocation1] sm:$0xff pattern:$0x75316420]  ;;  %v3109_v23 = vld.sshfl [vmem:[#allocation1 + $0x8] sm:$0xff pattern:$0x75316420] }
 0x337   : > { %1837 = vst [vmem:[#allocation1] ss:$2 sm:$0xff] %v3093_v62  ;;  %1476 = vrot.lane.b32.xlu2 %v1470_v10, %s2768_s11  ;;  %v2650_v10 = vld [vmem:[%s3337_s5 + $0x10] sm:$0xf] }
 0x338   : > { %v3113_v25 = vld.sshfl [vmem:[#allocation1 + $0x10] sm:$0xff pattern:$0x75316420]  ;;  %1667 = vrot.lane.b32.xlu0 %v1661_v21, %s2796_s20 }
 0x339   : > { %1839 = vst [vmem:[#allocation1 + $0x10] ss:$2 sm:$0xff] %v1834_v24 }
 0x33e   : > { %v1840_v26 = vld.sshfl [vmem:[#allocation1] sm:$0xff pattern:$0x75316420]  ;;  %v1841_v27 = vld.sshfl [vmem:[#allocation1 + $0x8] sm:$0xff pattern:$0x75316420] }
 0x33f   : > { %1933 = vst [vmem:[#allocation1] ss:$2 sm:$0xff] %v3093_v62  ;;  %1478 = vrot.lane.b32.xlu2 %v1471_v11, %s2768_s11  ;;  %1844 = vrot.lane.b32.xlu1 %v1840_v26, %s2785_s30  ;;  %s2807_s11 = smov 20  }
 0x340   : > { %v1842_v28 = vld.sshfl [vmem:[#allocation1 + $0x10] sm:$0xff pattern:$0x75316420]  ;;  %1846 = vrot.lane.b32.xlu0 %v1841_v27, %s2785_s30  ;;  %v1843_v29 = vld.sshfl [vmem:[#allocation1 + $0x18] sm:$0xff pattern:$0x75316420] }
 0x341   : > { %1935 = vst [vmem:[#allocation1 + $0x10] ss:$2 sm:$0xff] %v1834_v24 }
 0x346   : > { %v1936_v30 = vld.sshfl [vmem:[#allocation1] sm:$0xff pattern:$0x75316420]  ;;  %v1937_v31 = vld.sshfl [vmem:[#allocation1 + $0x8] sm:$0xff pattern:$0x75316420] }
 0x347   : > { %2030 = vst [vmem:[#allocation1] ss:$2 sm:$0xff] %v3093_v62  ;;  %1568 = vrot.lane.b32.xlu2 %v1563_v14, %s2795_s19  ;;  %1850 = vrot.lane.b32.xlu1 %v1843_v29, %s2785_s30  ;;  %s2803_s19 = smov 10  }
 0x348   : > { %1940 = vrot.lane.b32.xlu0 %v1936_v30, %s2797_s21  ;;  %v1938_v32 = vld.sshfl [vmem:[#allocation1 + $0x10] sm:$0xff pattern:$0x75316420]  ;;  %v1939_v33 = vld.sshfl [vmem:[#allocation1 + $0x18] sm:$0xff pattern:$0x75316420] }
 0x349   : > { %2032 = vst [vmem:[#allocation1 + $0x10] ss:$2 sm:$0xff] %v1834_v24 }
 0x34e   : > { %v2033_v34 = vld.sshfl [vmem:[#allocation1] sm:$0xff pattern:$0x75316420]  ;;  %v2034_v35 = vld.sshfl [vmem:[#allocation1 + $0x8] sm:$0xff pattern:$0x75316420] }
 0x34f   : > { %1663 = vrot.lane.b32.xlu2 %v1659_v17, %s2796_s20  ;;  %1944 = vrot.lane.b32.xlu1 %v1938_v32, %s2797_s21  ;;  %2126 = vst [vmem:[#allocation1] ss:$2 sm:$0xff] %v3093_v62  ;;  %v2671_v32 = vld [vmem:[%s3337_s5 + $0x1c] sm:$0xf] }
 0x350   : > { %1946 = vrot.lane.b32.xlu0 %v1939_v33, %s2797_s21  ;;  %v2035_v36 = vld.sshfl [vmem:[#allocation1 + $0x10] sm:$0xff pattern:$0x75316420]  ;;  %v2036_v37 = vld.sshfl [vmem:[#allocation1 + $0x18] sm:$0xff pattern:$0x75316420] }
 0x351   : > { %2128 = vst [vmem:[#allocation1 + $0x10] ss:$2 sm:$0xff] %v1834_v24 }
 0x356   : > { %v2129_v38 = vld.sshfl [vmem:[#allocation1] sm:$0xff pattern:$0x75316420]  ;;  %v2130_v39 = vld.sshfl [vmem:[#allocation1 + $0x8] sm:$0xff pattern:$0x75316420] }
 0x357   : > { %1669 = vrot.lane.b32.xlu2 %v1662_v20, %s2796_s20  ;;  %2039 = vrot.lane.b32.xlu1 %v2034_v35, %s2787_s12  ;;  %s2805_s20 = smov 28  }
 0x358   : > { %2041 = vrot.lane.b32.xlu0 %v2035_v36, %s2787_s12  ;;  %v2132_v40 = vld.sshfl [vmem:[#allocation1 + $0x18] sm:$0xff pattern:$0x75316420]  ;;  %v2131_v45 = vld.sshfl [vmem:[#allocation1 + $0x10] sm:$0xff pattern:$0x75316420] }
 0x35f   : > { %1848 = vrot.lane.b32.xlu2 %v1842_v28, %s2785_s30  ;;  %2133 = vrot.lane.b32.xlu1 %v2129_v38, %s2788_s13  ;;  %s2809_s30 = smov 30  }
 0x360   : > { %2135 = vrot.lane.b32.xlu0 %v2130_v39, %s2788_s13 }
 0x367   : > { %1942 = vrot.lane.b32.xlu2 %v1937_v31, %s2797_s21  ;;  %2139 = vrot.lane.b32.xlu1 %v2132_v40, %s2788_s13  ;;  %v2678_v40 = vld [vmem:[%s3337_s5 + $0x20] sm:$0xf]  ;;  %s2806_s21 = smov 4  }
 0x36f   : > { %2037 = vrot.lane.b32.xlu2 %v2033_v34, %s2787_s12 }
 0x371   : > { %v1385_v41 = vpop.permute.xlu2 %1384 }
 0x377   : > { %2043 = vrot.lane.b32.xlu2 %v2036_v37, %s2787_s12 }
 0x379   : > { %v1387_v42 = vpop.permute.xlu2 %1386 }
 0x37a   : > { %v1393_v44 = vsel %vm1392_vm12, %v1385_v41, %v1387_v42 }
 0x37b   : > { %2624 = vmatpush.msk.msra.mxu3 %vm464_vm6, %v1393_v44 }
 0x37c   : > { %2625 = vmatmul.msk.f32.vlgmr.msra.gmra.mxu3 %vm460_vm7, %v2623_v43 }
 0x37f   : > { %2137 = vrot.lane.b32.xlu2 %v2131_v45, %s2788_s13 }
 0x381   : > { %v1389_v46 = vpop.permute.xlu2 %1388 }
 0x382   : > { %v1394_v47 = vsel %vm1392_vm12, %v1387_v42, %v1389_v46 }
 0x383   : > { %2626 = vmatpush.msk.msrb.mxu0 %vm464_vm6, %v1394_v47 }
 0x384   : > { %2627 = vmatmul.msk.f32.vlgmr.msrb.gmra.mxu0 %vm460_vm7, %v2623_v43 }
 0x389   : > { %v1391_v48 = vpop.permute.xlu2 %1390 }
 0x38a   : > { %v1395_v49 = vsel %vm1392_vm12, %v1389_v46, %v1391_v48  ;;  %vm2384_vm12 = vcmask 1044352  }
 0x38b   : > { %2628 = vmatpush.msk.msrb.mxu1 %vm464_vm6, %v1395_v49 }
 0x38c   : > { %2629 = vmatmul.msk.f32.vlgmr.msrb.gmra.mxu1 %vm460_vm7, %v2623_v43 }
 0x391   : > { %v1477_v50 = vpop.permute.xlu2 %1476  ;;  %v1475_v51 = vpop.permute.xlu1 %1474 }
 0x392   : > { %v1482_v53 = vsel %vm1480_vm13, %v1475_v51, %v1477_v50  ;;  %v1473_v54 = vpop.permute.xlu0 %1472 }
 0x393   : > { %v1481_v55 = vsel %vm1480_vm13, %v1473_v54, %v1475_v51  ;;  %2632 = vmatpush.msk.msrb.mxu3 %vm464_vm6, %v1482_v53 }
 0x394   : > { %2630 = vmatpush.msk.msrb.mxu2 %vm464_vm6, %v1481_v55  ;;  %2633 = vmatmul.msk.f32.vlgmr.msrb.gmra.mxu3 %vm460_vm7, %v1370_v52 }
 0x395   : > { %2631 = vmatmul.msk.f32.vlgmr.msrb.gmra.mxu2 %vm460_vm7, %v1370_v52 }
 0x399   : > { %v1479_v56 = vpop.permute.xlu2 %1478 }
 0x39a   : > { %v1483_v57 = vsel %vm1480_vm13, %v1477_v50, %v1479_v56  ;;  %v1567_v58 = vpop.permute.xlu0 %1566  ;;  %vm2381_vm13 = vcmask 932864  }
 0x39b   : > { %2634 = vmatpush.msk.msra.mxu0 %vm464_vm6, %v1483_v57  ;;  %v1571_v59 = vpop.permute.xlu1 %1570 }
 0x39c   : > { %2635 = vmatmul.msk.f32.vlgmr.msra.gmra.mxu0 %vm460_vm7, %v1370_v52 }
 0x3a1   : > { %v1569_v0 = vpop.permute.xlu2 %1568 }
 0x3a2   : > { %v1575_v1 = vsel %vm1574_vm14, %v1567_v58, %v1569_v0  ;;  %v1576_v60 = vsel %vm1574_vm14, %v1569_v0, %v1571_v59  ;;  %v1573_v62 = vpop.permute.xlu0 %1572 }
 0x3a3   : > { %v1577_v2 = vsel %vm1574_vm14, %v1571_v59, %v1573_v62  ;;  %2637 = vmatpush.msk.msra.mxu1 %vm464_vm6, %v1575_v1  ;;  %2639 = vmatpush.msk.msra.mxu2 %vm464_vm6, %v1576_v60  ;;  %v1666_v4 = vpop.permute.xlu1 %1665  ;;  %v2217_v60 = vld [vmem:[%s3339_s7] sm:$0xf] }
 0x3a4   : > { %2641 = vmatpush.msk.msra.mxu3 %vm464_vm6, %v1577_v2  ;;  %2638 = vmatmul.msk.f32.vlgmr.msra.gmra.mxu1 %vm460_vm7, %v2636_v3  ;;  %v2281_v62 = vld [vmem:[%s2885_s10] sm:$0xf] }
 0x3a5   : > { %2640 = vmatmul.msk.f32.vlgmr.msra.gmra.mxu2 %vm460_vm7, %v2636_v3  ;;  %2642 = vmatmul.msk.f32.vlgmr.msra.gmra.mxu3 %vm460_vm7, %v2636_v3  ;;  %2283 = vst [vmem:[#allocation1] ss:$2 sm:$0xff] %v2281_v62 }
 0x3a6   : > { %2651 = vmatpush.msk.msrb.mxu3 %vm464_vm6, %v3107_v22  ;;  %2271 = vperm.xlu1 %2754, %v2217_v60  }
 0x3a9   : > { %v1664_v5 = vpop.permute.xlu2 %1663 }
 0x3aa   : > { %v1668_v6 = vpop.permute.xlu0 %1667  ;;  %v1672_v7 = vsel %vm1671_vm15, %v1664_v5, %v1666_v4 }
 0x3ab   : > { %v1673_v9 = vsel %vm1671_vm15, %v1666_v4, %v1668_v6  ;;  %2644 = vmatpush.msk.msrb.mxu0 %vm464_vm6, %v1672_v7 }
 0x3ac   : > { %2646 = vmatpush.msk.msrb.mxu1 %vm464_vm6, %v1673_v9  ;;  %2645 = vmatmul.msk.f32.vlgmr.msrb.gmra.mxu0 %vm460_vm7, %v2643_v8 }
 0x3ad   : > { %2653 = vmatpush.msk.msra.mxu0 %vm464_vm6, %v3109_v23  ;;  %2652 = vmatmul.msk.f32.vlgmr.msrb.gmra.mxu3 %vm460_vm7, %v2650_v10 }
 0x3ae   : > { %2655 = vmatpush.msk.msra.mxu1 %vm464_vm6, %v3113_v25  ;;  %v2664_v25 = vld [vmem:[%s3337_s5 + $0x18] sm:$0xf] }
 0x3af   : > { %2647 = vmatmul.msk.f32.vlgmr.msrb.gmra.mxu1 %vm460_vm7, %v2643_v8 }
 0x3b1   : > { %v1670_v11 = vpop.permute.xlu2 %1669  ;;  %v1845_v13 = vpop.permute.xlu1 %1844 }
 0x3b2   : > { %v1674_v14 = vsel %vm1671_vm15, %v1668_v6, %v1670_v11  ;;  %v1847_v15 = vpop.permute.xlu0 %1846  ;;  %v2295_v11 = vld [vmem:[%s2885_s10] sm:$0xf] }
 0x3b3   : > { %v1852_v16 = vsel %vm456_vm8, %v1845_v13, %v1847_v15  ;;  %2648 = vmatpush.msk.msrb.mxu2 %vm464_vm6, %v1674_v14 }
 0x3b4   : > { %2649 = vmatmul.msk.f32.vlgmr.msrb.gmra.mxu2 %vm460_vm7, %v2643_v8  ;;  %2654 = vmatmul.msk.f32.vlgmr.msra.gmra.mxu0 %vm460_vm7, %v2650_v10 }
 0x3b5   : > { %2658 = vmatpush.msk.msra.mxu2 %vm464_vm6, %v1852_v16 }
 0x3b7   : > { %2656 = vmatmul.msk.f32.vlgmr.msra.gmra.mxu1 %vm460_vm7, %v2650_v10 }
 0x3b9   : > { %v1849_v17 = vpop.permute.xlu2 %1848  ;;  %v1851_v18 = vpop.permute.xlu1 %1850 }
 0x3ba   : > { %v1853_v20 = vsel %vm456_vm8, %v1847_v15, %v1849_v17  ;;  %v1854_v21 = vsel %vm456_vm8, %v1849_v17, %v1851_v18  ;;  %v1941_v22 = vpop.permute.xlu0 %1940  ;;  %v2284_v15 = vld.sshfl [vmem:[#allocation1] sm:$0xff pattern:$0x75316420] }
 0x3bb   : > { %2660 = vmatpush.msk.msra.mxu3 %vm464_vm6, %v1853_v20  ;;  %2662 = vmatpush.msk.msrb.mxu0 %vm464_vm6, %v1854_v21  ;;  %2297 = vst [vmem:[#allocation1] ss:$2 sm:$0xff] %v2295_v11 }
 0x3bc   : > { %2659 = vmatmul.msk.f32.vlgmr.msra.gmra.mxu2 %vm460_vm7, %v2657_v19  ;;  %2661 = vmatmul.msk.f32.vlgmr.msra.gmra.mxu3 %vm460_vm7, %v2657_v19 }
 0x3bd   : > { %2663 = vmatmul.msk.f32.vlgmr.msrb.gmra.mxu0 %vm460_vm7, %v2657_v19  ;;  %2285 = vrot.lane.b32.xlu1 %v2284_v15, %s2798_s25  ;;  %v2451_v15 = vld [vmem:[%s2885_s10 + $0x4] sm:$0xf]  ;;  %s2811_s25 = smov 12  }
 0x3c1   : > { %v1945_v23 = vpop.permute.xlu1 %1944  ;;  %v1943_v24 = vpop.permute.xlu2 %1942 }
 0x3c2   : > { %v1949_v26 = vsel %vm1948_vm0, %v1941_v22, %v1943_v24  ;;  %v1950_v27 = vsel %vm1948_vm0, %v1943_v24, %v1945_v23  ;;  %v1947_v28 = vpop.permute.xlu0 %1946 }
 0x3c3   : > { %v1951_v29 = vsel %vm1948_vm0, %v1945_v23, %v1947_v28  ;;  %2665 = vmatpush.msk.msrb.mxu1 %vm464_vm6, %v1949_v26  ;;  %2667 = vmatpush.msk.msrb.mxu2 %vm464_vm6, %v1950_v27  ;;  %v2309_v26 = vld [vmem:[%s2885_s10] sm:$0xf] }
 0x3c4   : > { %2669 = vmatpush.msk.msrb.mxu3 %vm464_vm6, %v1951_v29  ;;  %2666 = vmatmul.msk.f32.vlgmr.msrb.gmra.mxu1 %vm460_vm7, %v2664_v25  ;;  %v3237_v29 = vld.sshfl [vmem:[#allocation1] sm:$0xff pattern:$0x75316420] }
 0x3c5   : > { %2668 = vmatmul.msk.f32.vlgmr.msrb.gmra.mxu2 %vm460_vm7, %v2664_v25  ;;  %2670 = vmatmul.msk.f32.vlgmr.msrb.gmra.mxu3 %vm460_vm7, %v2664_v25  ;;  %2311 = vst [vmem:[#allocation1] ss:$2 sm:$0xff] %v2309_v26 }
 0x3c9   : > { %v2040_v30 = vpop.permute.xlu1 %2039  ;;  %v2038_v31 = vpop.permute.xlu2 %2037 }
 0x3ca   : > { %v2042_v33 = vpop.permute.xlu0 %2041  ;;  %v2045_v34 = vsel %vm726_vm9, %v2038_v31, %v2040_v30 }
 0x3cb   : > { %v2046_v35 = vsel %vm726_vm9, %v2040_v30, %v2042_v33  ;;  %2672 = vmatpush.msk.msra.mxu0 %vm464_vm6, %v2045_v34 }
 0x3cc   : > { %2674 = vmatpush.msk.msra.mxu1 %vm464_vm6, %v2046_v35  ;;  %2673 = vmatmul.msk.f32.vlgmr.msra.gmra.mxu0 %vm460_vm7, %v2671_v32 }
 0x3cd   : > { %2675 = vmatmul.msk.f32.vlgmr.msra.gmra.mxu1 %vm460_vm7, %v2671_v32 }
 0x3d1   : > { %v2044_v36 = vpop.permute.xlu2 %2043  ;;  %v2134_v37 = vpop.permute.xlu1 %2133 }
 0x3d2   : > { %v2047_v38 = vsel %vm726_vm9, %v2042_v33, %v2044_v36  ;;  %v2136_v39 = vpop.permute.xlu0 %2135 }
 0x3d3   : > { %v2141_v41 = vsel %vm823_vm11, %v2134_v37, %v2136_v39  ;;  %2676 = vmatpush.msk.msra.mxu2 %vm464_vm6, %v2047_v38 }
 0x3d4   : > { %2679 = vmatpush.msk.msra.mxu3 %vm464_vm6, %v2141_v41  ;;  %2677 = vmatmul.msk.f32.vlgmr.msra.gmra.mxu2 %vm460_vm7, %v2671_v32 }
 0x3d5   : > { %2680 = vmatmul.msk.f32.vlgmr.msra.gmra.mxu3 %vm460_vm7, %v2678_v40 }
 0x3d9   : > { %v2138_v42 = vpop.permute.xlu2 %2137  ;;  %v2140_v43 = vpop.permute.xlu1 %2139 }
 0x3da   : > { %v2142_v44 = vsel %vm823_vm11, %v2136_v39, %v2138_v42  ;;  %v2143_v45 = vsel %vm823_vm11, %v2138_v42, %v2140_v43  ;;  %v2323_v42 = vld [vmem:[%s2885_s10] sm:$0xf]  ;;  %vm2279_vm11 = vcmask 125952  }
 0x3db   : > { %2681 = vmatpush.msk.msrb.mxu0 %vm464_vm6, %v2142_v44  ;;  %2683 = vmatpush.msk.msrb.mxu1 %vm464_vm6, %v2143_v45 }
 0x3dc   : > { %2682 = vmatmul.msk.f32.vlgmr.msrb.gmra.mxu0 %vm460_vm7, %v2678_v40  ;;  %2684 = vmatmul.msk.f32.vlgmr.msrb.gmra.mxu1 %vm460_vm7, %v2678_v40 }
 0x3ff   : > { %v1422_v46 = vpop.f32.mrf.mxu3 }
 0x401   : > { %v1442_v48 = vpop.f32.mrf.mxu0 }
 0x409   : > { %v1462_v47 = vpop.f32.mrf.mxu1 }
 0x417   : > { %v1530_v50 = vpop.f32.mrf.mxu3 }
 0x418   : > { %v1510_v49 = vpop.f32.mrf.mxu2  ;;  %v1531_v4 = vadd.f32 %v1530_v50, %v1442_v48 }
 0x419   : > { %v1550_v52 = vpop.f32.mrf.mxu0  ;;  %v1511_v1 = vadd.f32 %v1510_v49, %v1422_v46  ;;  %v3261_v49 = vld.sshfl [vmem:[#allocation1] sm:$0xff pattern:$0x75316420] }
 0x41a   : > { %v1551_v3 = vadd.f32 %v1550_v52, %v1462_v47  ;;  %2325 = vst [vmem:[#allocation1] ss:$2 sm:$0xff] %v2323_v42  ;;  %v2272_v42 = vpop.permute.xlu1 %2271 }
 0x421   : > { %v1604_v51 = vpop.f32.mrf.mxu1  ;;  %v2326_v60 = vld.sshfl [vmem:[#allocation1] sm:$0xff pattern:$0x75316420] }
 0x422   : > { %v1647_v6 = vadd.f32 %v1604_v51, %v1511_v1  ;;  %2339 = vst [vmem:[#allocation1] ss:$2 sm:$0xff] %v2337_v63 }
 0x428   : > { %v1624_v53 = vpop.f32.mrf.mxu2  ;;  %v1644_v54 = vpop.f32.mrf.mxu3 }
 0x429   : > { %v1701_v56 = vpop.f32.mrf.mxu0  ;;  %v1649_v9 = vadd.f32 %v1644_v54, %v1551_v3  ;;  %v1648_v10 = vadd.f32 %v1624_v53, %v1531_v4  ;;  %v2340_v62 = vld.sshfl [vmem:[#allocation1] sm:$0xff pattern:$0x75316420] }
 0x42a   : > { %v1744_v13 = vadd.f32 %v1701_v56, %v1647_v6  ;;  %2353 = vst [vmem:[#allocation1] ss:$2 sm:$0xff] %v2351_v12  ;;  %v2386_v4 = vld [vmem:[%s2885_s10 + $0x4] sm:$0xf] }
 0x42b   : > { %v2399_v6 = vld [vmem:[%s2885_s10 + $0x4] sm:$0xf] }
 0x42c   : > { %v1721_v55 = vpop.f32.mrf.mxu1 }
 0x42d   : > { %v1745_v16 = vadd.f32 %v1721_v55, %v1648_v10  ;;  %v2425_v10 = vld [vmem:[%s2885_s10 + $0x4] sm:$0xf] }
 0x430   : > { %v1785_v59 = vpop.f32.mrf.mxu3 }
 0x431   : > { %v1805_v0 = vpop.f32.mrf.mxu0  ;;  %v1828_v17 = vadd.f32 %v1785_v59, %v1744_v13  ;;  %v3278_v3 = vld.sshfl [vmem:[#allocation1] sm:$0xff pattern:$0x75316420] }
 0x432   : > { %v1829_v19 = vadd.f32 %v1805_v0, %v1745_v16  ;;  %v2438_v13 = vld [vmem:[%s2885_s10 + $0x4] sm:$0xf] }
 0x434   : > { %v1825_v58 = vpop.f32.mrf.mxu1 }
 0x437   : > { %v1741_v57 = vpop.f32.mrf.mxu2 }
 0x438   : > { %v1746_v14 = vadd.f32 %v1741_v57, %v1649_v9 }
 0x43a   : > { %v1921_v8 = vpop.f32.mrf.mxu0  ;;  %v1830_v20 = vadd.f32 %v1825_v58, %v1746_v14 }
 0x43c   : > { %v1926_v27 = vadd.f32 %v1921_v8, %v1830_v20  ;;  %v2412_v8 = vld [vmem:[%s2885_s10 + $0x4] sm:$0xf] }
 0x43d   : > { %v2484_v20 = vld [vmem:[%s2885_s10 + $0x4] sm:$0xf] }
 0x43f   : > { %v1881_v2 = vpop.f32.mrf.mxu2  ;;  %v1901_v5 = vpop.f32.mrf.mxu3 }
 0x440   : > { %v1924_v22 = vadd.f32 %v1881_v2, %v1828_v17  ;;  %v1925_v25 = vadd.f32 %v1901_v5, %v1829_v19  ;;  %v2365_v2 = vld [vmem:[%s2885_s10] sm:$0xf]  ;;  %v2464_v17 = vld [vmem:[%s2885_s10 + $0x4] sm:$0xf] }
 0x441   : > { %v1978_v7 = vpop.f32.mrf.mxu1  ;;  %2367 = vst [vmem:[#allocation1] ss:$2 sm:$0xff] %v2365_v2 }
 0x442   : > { %v2021_v30 = vadd.f32 %v1978_v7, %v1924_v22 }
 0x448   : > { %v1998_v18 = vpop.f32.mrf.mxu2  ;;  %v2018_v21 = vpop.f32.mrf.mxu3  ;;  %v2368_v5 = vld.sshfl [vmem:[#allocation1] sm:$0xff pattern:$0x75316420] }
 0x449   : > { %v2074_v23 = vpop.f32.mrf.mxu0  ;;  %v2022_v28 = vadd.f32 %v1998_v18, %v1925_v25  ;;  %v2023_v31 = vadd.f32 %v2018_v21, %v1926_v27  ;;  %2388 = vst [vmem:[#allocation1] ss:$2 sm:$0xff] %v2386_v4 }
 0x44a   : > { %v2094_v24 = vpop.f32.mrf.mxu1  ;;  %v2117_v32 = vadd.f32 %v2074_v23, %v2021_v30 }
 0x44b   : > { %v2118_v34 = vadd.f32 %v2094_v24, %v2022_v28 }
 0x450   : > { %v2389_v7 = vld.sshfl [vmem:[#allocation1] sm:$0xff pattern:$0x75316420] }
 0x451   : > { %2390 = vrot.lane.b32.xlu1 %v2389_v7, %s2800_s15  ;;  %2401 = vst [vmem:[#allocation1] ss:$2 sm:$0xff] %v2399_v6 }
 0x457   : > { %v2114_v33 = vpop.f32.mrf.mxu2 }
 0x458   : > { %v2119_v35 = vadd.f32 %v2114_v33, %v2023_v31  ;;  %v2170_v36 = vpop.f32.mrf.mxu3  ;;  %v2402_v9 = vld.sshfl [vmem:[#allocation1] sm:$0xff pattern:$0x75316420] }
 0x459   : > { %v3239_v37 = vadd.f32 %v2170_v36, %v2117_v32  ;;  %v2190_v38 = vpop.f32.mrf.mxu0  ;;  %v2210_v39 = vpop.f32.mrf.mxu1  ;;  %2414 = vst [vmem:[#allocation1] ss:$2 sm:$0xff] %v2412_v8 }
 0x45a   : > { %v3241_v40 = vadd.f32 %v2190_v38, %v2118_v34  ;;  %v3243_v41 = vadd.f32 %v2210_v39, %v2119_v35  ;;  %v2216_v35 = vld [vmem:[%s3338_s6] sm:$0xf] }
 0x45b   : > { %v2218_v43 = vsel %vm3050_vm1, %v3239_v37, 0.0  ;;  %v2229_v44 = vmul.f32 %v3239_v37, %v3239_v37 }
 0x45c   : > { %v2219_v45 = vsel %vm3054_vm2, %v3241_v40, 0.0  ;;  %v2230_v46 = vmul.f32 %v3241_v40, %v3241_v40  ;;  %v2231_v47 = vmul.f32 %v3243_v41, %v3243_v41  ;;  %v2220_v48 = vsel %vm3066_vm3, %v3243_v41, 0.0 }
 0x45d   : > { %v2221_v50 = vsel %vm464_vm6, %v2218_v43, 0.0  ;;  %v2222_v51 = vsel %vm464_vm6, %v2219_v45, 0.0  ;;  %v2232_v52 = vsel %vm3050_vm1, %v2229_v44, 0.0  ;;  %v2224_v56 = vsel %vm464_vm6, %v2220_v48, 0.0  ;;  %v2286_v43 = vpop.permute.xlu1 %2285 }
 0x45e   : > { %v2223_v53 = vadd.f32 %v2222_v51, %v2221_v50  ;;  %v2233_v54 = vsel %vm3054_vm2, %v2230_v46, 0.0  ;;  %v2234_v55 = vsel %vm3066_vm3, %v2231_v47, 0.0  ;;  %v2235_v57 = vsel %vm464_vm6, %v2232_v52, 0.0 }
 0x45f   : > { %v2236_v58 = vsel %vm464_vm6, %v2233_v54, 0.0  ;;  %v2238_v0 = vsel %vm464_vm6, %v2234_v55, 0.0  ;;  %vm2307_vm1 = vcmask 388352   ;;  %vm2321_vm2 = vcmask 519552  }
 0x460   : > { %v2225_v59 = vadd.f32 %v2224_v56, %v2223_v53  ;;  %v2237_v61 = vadd.f32 %v2236_v58, %v2235_v57  ;;  %v2415_v11 = vld.sshfl [vmem:[#allocation1] sm:$0xff pattern:$0x75316420]  ;;  %vm2335_vm3 = vcmask 650752  }
 0x461   : > { %2427 = vst [vmem:[#allocation1] ss:$2 sm:$0xff] %v2425_v10 }
 0x462   : > { %2226 = vadd.xlane.f32.xlu0 %v2225_v59  ;;  %v2239_v1 = vadd.f32 %v2238_v0, %v2237_v61  ;;  %v2277_v0 = vld [vmem:[%s2885_s10] sm:$0xf]  ;;  %s2813_s10 = smov 122  }
 0x464   : > { %2240 = vadd.xlane.f32.xlu2 %v2239_v1 }
 0x468   : > { %v2428_v14 = vld.sshfl [vmem:[#allocation1] sm:$0xff pattern:$0x75316420] }
 0x469   : > { %2440 = vst [vmem:[#allocation1] ss:$2 sm:$0xff] %v2438_v13 }
 0x470   : > { %v2441_v16 = vld.sshfl [vmem:[#allocation1] sm:$0xff pattern:$0x75316420] }
 0x471   : > { %2453 = vst [vmem:[#allocation1] ss:$2 sm:$0xff] %v2451_v15 }
 0x476   : > { %2369 = vrot.lane.b32.xlu0 %v2368_v5, %s2799_s26  ;;  %s2812_s26 = smov 112  }
 0x478   : > { %v2454_v18 = vld.sshfl [vmem:[#allocation1] sm:$0xff pattern:$0x75316420] }
 0x479   : > { %2466 = vst [vmem:[#allocation1] ss:$2 sm:$0xff] %v2464_v17 }
 0x47c   : > { %2403 = vrot.lane.b32.xlu2 %v2402_v9, %s2794_s18  ;;  %s2804_s18 = smov 26  }
 0x47e   : > { %2429 = vrot.lane.b32.xlu0 %v2428_v14, %s2802_s17  ;;  %s3305_s17 = scalar_lea.vmem %s3340_s8, %s2687_s29  ;;  %s2815_s29 = smov 120  }
 0x480   : > { %v2467_v19 = vld.sshfl [vmem:[#allocation1] sm:$0xff pattern:$0x75316420] }
 0x481   : > { %2468 = vrot.lane.b32.xlu1 %v2467_v19, %s2805_s20  ;;  %2486 = vst [vmem:[#allocation1] ss:$2 sm:$0xff] %v2484_v20  ;;  %s2821_s20 = smov 98  }
 0x484   : > { %2327 = vrot.lane.b32.xlu2 %v2326_v60, %s2801_s16 }
 0x486   : > { %2341 = vrot.lane.b32.xlu0 %v2340_v62, %s2803_s19  ;;  %s2819_s19 = smov 100  }
 0x488   : > { %v2487_v26 = vld.sshfl [vmem:[#allocation1] sm:$0xff pattern:$0x75316420] }
 0x489   : > { %2299 = vrot.lane.b32.xlu1 %v3237_v29, %s2806_s21  ;;  %s2822_s21 = smov 116  }
 0x48c   : > { %2455 = vrot.lane.b32.xlu2 %v2454_v18, %s2804_s18  ;;  %s2820_s18 = smov 114  }
 0x48e   : > { %2488 = vrot.lane.b32.xlu0 %v2487_v26, %s2809_s30 }
 0x491   : > { %2416 = vrot.lane.b32.xlu1 %v2415_v11, %s2807_s11  ;;  %s2823_s11 = smov 102  }
 0x499   : > { %2313 = vrot.lane.b32.xlu1 %v3261_v49, %s2808_s22 }
 0x4c3   : > { %v2391_v44 = vpop.permute.xlu1 %2390 }
 0x4d5   : > { %v2227_v21 = vpop.xlane.xlu0 %2226 }
 0x4d6   : > { %v2228_v22 = vmul.f32 0.00390625, %v2227_v21 }
 0x4d7   : > { %v2241_v23 = vpop.xlane.xlu2 %2240 }
 0x4d8   : > { %v2242_v24 = vmul.f32 0.00390625, %v2241_v23  ;;  %v2243_v25 = vmul.f32 %v2228_v22, %v2228_v22  ;;  %v2246_v49 = vsub.f32 %v3239_v37, %v2228_v22  ;;  %v2247_v50 = vsub.f32 %v3241_v40, %v2228_v22 }
 0x4d9   : > { %v2248_v40 = vsub.f32 %v3243_v41, %v2228_v22 }
 0x4da   : > { %v2244_v27 = vsub.f32 %v2242_v24, %v2243_v25 }
 0x4dc   : > { %v2245_v28 = vmax.f32 %v2244_v27, 0.0 }
 0x4de   : > { %v2249_v30 = vadd.f32 1e-05, %v2245_v28 }
 0x4df   : > { %v2404_v57 = vpop.permute.xlu2 %2403 }
 0x4e0   : > { %2758 = vrsqrt.f32 %v2249_v30  ;;  %vm2256_vm8 = vweird.f32 %v2249_v30 }
 0x4e6   : > { %v2759_v29 = vpop.eup %2758 }
 0x4e7   : > { %v2251_v31 = vmul.f32 %v2759_v29, %v2249_v30  ;;  %vm2257_vm7 = vweird.f32 %v2759_v29  ;;  %v2328_v4 = vpop.permute.xlu2 %2327 }
 0x4e8   : > { %vm2258_vm9 = vmor %vm2256_vm8, %vm2257_vm7  ;;  %v2370_v56 = vpop.permute.xlu0 %2369 }
 0x4e9   : > { %v2252_v32 = vmul.f32 %v2759_v29, %v2251_v31 }
 0x4eb   : > { %v2253_v33 = vmul.f32 0.5, %v2252_v32 }
 0x4ed   : > { %v2254_v34 = vsub.f32 1.5, %v2253_v33 }
 0x4ef   : > { %v2255_v36 = vmul.f32 %v2759_v29, %v2254_v34  ;;  %v2456_v19 = vpop.permute.xlu2 %2455 }
 0x4f0   : > { %v2430_v63 = vpop.permute.xlu0 %2429 }
 0x4f1   : > { %v2259_v38 = vsel %vm2258_vm9, %v2759_v29, %v2255_v36 }
 0x4f2   : > { %v2260_v39 = vmul.f32 %v2259_v38, %v2216_v35 }
 0x4f3   : > { %v2469_v45 = vpop.permute.xlu1 %2468 }
 0x4f4   : > { %2263 = vperm.xlu1 %2754, %v2260_v39  }
 0x4f8   : > { %v2342_v9 = vpop.permute.xlu0 %2341 }
 0x4fb   : > { %v2300_v46 = vpop.permute.xlu1 %2299 }
 0x4fc   : > { %2442 = vrot.lane.b32.xlu1 %v2441_v16, %s2810_s24 }
 0x500   : > { %v2489_v18 = vpop.permute.xlu0 %2488 }
 0x503   : > { %v2417_v47 = vpop.permute.xlu1 %2416 }
 0x504   : > { %2355 = vrot.lane.b32.xlu1 %v3278_v3, %s2811_s25 }
 0x50b   : > { %v2314_v48 = vpop.permute.xlu1 %2313 }
 0x566   : > { %v2264_v51 = vpop.permute.xlu1 %2263 }
 0x567   : > { %v2266_v52 = vmul.f32 %v2264_v51, %v2246_v49  ;;  %v2267_v53 = vmul.f32 %v2264_v51, %v2247_v50  ;;  %v2268_v62 = vmul.f32 %v2264_v51, %v2248_v40 }
 0x569   : > { %v2274_v54 = vadd.f32 %v2272_v42, %v2266_v52  ;;  %v2275_v55 = vadd.f32 %v2272_v42, %v2267_v53  ;;  %v2276_v2 = vadd.f32 %v2272_v42, %v2268_v62 }
 0x56b   : > { %v2406_v58 = vadd.f32 %v2404_v57, %v2275_v55  ;;  %v2393_v59 = vadd.f32 %v2391_v44, %v2275_v55  ;;  %v2288_v61 = vadd.f32 %v2286_v43, %v2274_v54  ;;  %v2278_v37 = vadd.f32 %v2277_v0, %v2274_v54 }
 0x56c   : > { %v2316_v1 = vadd.f32 %v2314_v48, %v2274_v54  ;;  %v2302_v60 = vadd.f32 %v2300_v46, %v2274_v54  ;;  %v2419_v12 = vadd.f32 %v2417_v47, %v2275_v55  ;;  %v2330_v5 = vadd.f32 %v2328_v4, %v2274_v54 }
 0x56d   : > { %2408 = vrot.lane.b32.xlu0 %v2406_v58, %s2787_s12  ;;  %2395 = vrot.lane.b32.xlu2 %v2393_v59, %s2812_s26  ;;  %2280 = vst.msk [vmem:[%s3305_s17] sm:$0xf] %vm2279_vm11, %v2278_v37  ;;  %v2432_v7 = vadd.f32 %v2430_v63, %v2275_v55  ;;  %v2472_v8 = vadd.f32 %v2469_v45, %v2276_v2  ;;  %s2817_s12 = smov 106  }
 0x56e   : > { %2290 = vrot.lane.b32.xlu1 %v2288_v61, %s2786_s9  ;;  %v2443_v3 = vpop.permute.xlu1 %2442  ;;  %v2373_v41 = vadd.f32 %v2370_v56, %v2275_v55  ;;  %s2816_s9 = smov 104   ;;  %v2471_v13 = vadd.f32 %v2469_v45, %v2275_v55  ;;  %v2372_v14 = vadd.f32 %v2370_v56, %v2274_v54  ;;  %v2344_v15 = vadd.f32 %v2342_v9, %v2274_v54 }
 0x56f   : > { %v2445_v6 = vadd.f32 %v2443_v3, %v2275_v55  ;;  %v2475_v10 = vrot.slane %v2472_v8, 4  ;;  %v2491_v21 = vadd.f32 %v2489_v18, %v2276_v2  ;;  %v2458_v22 = vadd.f32 %v2456_v19, %v2275_v55 }
 0x570   : > { %v2376_v11 = vrot.slane %v2373_v41, 4 }
 0x571   : > { %v2476_v16 = vsel %vm464_vm6, %v2471_v13, %v2475_v10 }
 0x572   : > { %v2377_v17 = vsel %vm464_vm6, %v2372_v14, %v2376_v11  ;;  %vm2293_vm6 = vcmask 257152  }
 0x575   : > { %2318 = vrot.lane.b32.xlu0 %v2316_v1, %s2813_s10  ;;  %2304 = vrot.lane.b32.xlu2 %v2302_v60, %s2814_s28 }
 0x576   : > { %2421 = vrot.lane.b32.xlu1 %v2419_v12, %s2789_s14  ;;  %s2818_s14 = smov 118   ;;  %v2356_v20 = vpop.permute.xlu1 %2355 }
 0x577   : > { %v2358_v23 = vadd.f32 %v2356_v20, %v2274_v54 }
 0x57d   : > { %2332 = vrot.lane.b32.xlu0 %v2330_v5, %s2815_s29  ;;  %2434 = vrot.lane.b32.xlu2 %v2432_v7, %s2817_s12 }
 0x57e   : > { %2447 = vrot.lane.b32.xlu1 %v2445_v6, %s2816_s9 }
 0x585   : > { %2346 = vrot.lane.b32.xlu0 %v2344_v15, %s2818_s14  ;;  %2378 = vrot.lane.b32.xlu2 %v2377_v17, %s2820_s18 }
 0x586   : > { %2477 = vrot.lane.b32.xlu1 %v2476_v16, %s2819_s19 }
 0x58d   : > { %2493 = vrot.lane.b32.xlu0 %v2491_v21, %s2821_s20  ;;  %2460 = vrot.lane.b32.xlu2 %v2458_v22, %s2823_s11 }
 0x58e   : > { %2360 = vrot.lane.b32.xlu1 %v2358_v23, %s2822_s21 }
 0x5c7   : > { %v2396_v24 = vpop.permute.xlu2 %2395 }
 0x5c8   : > { %2398 = vst.msk [vmem:[%s3305_s17 + $0x4] sm:$0xf] %vm2279_vm11, %v2396_v24 }
 0x5cf   : > { %v2305_v25 = vpop.permute.xlu2 %2304 }
 0x5d7   : > { %v2435_v26 = vpop.permute.xlu2 %2434 }
 0x5df   : > { %v2409_v27 = vpop.permute.xlu0 %2408  ;;  %v2379_v30 = vpop.permute.xlu2 %2378 }
 0x5e0   : > { %v2291_v28 = vpop.permute.xlu1 %2290  ;;  %2411 = vst.msk [vmem:[%s3305_s17 + $0x4] sm:$0xf] %vm2293_vm6, %v2409_v27  ;;  %v2380_v42 = vrot.slane %v2379_v30, 4 }
 0x5e1   : > { %2294 = vst.msk [vmem:[%s3305_s17] sm:$0xf] %vm2293_vm6, %v2291_v28 }
 0x5e2   : > { %2308 = vst.msk [vmem:[%s3305_s17] sm:$0xf] %vm2307_vm1, %v2305_v25  ;;  %v2382_v45 = vsel %vm2381_vm13, %v2379_v30, %v2380_v42 }
 0x5e7   : > { %v2319_v29 = vpop.permute.xlu0 %2318  ;;  %v2461_v34 = vpop.permute.xlu2 %2460 }
 0x5e8   : > { %v2422_v31 = vpop.permute.xlu1 %2421  ;;  %2322 = vst.msk [vmem:[%s3305_s17] sm:$0xf] %vm2321_vm2, %v2319_v29 }
 0x5e9   : > { %2424 = vst.msk [vmem:[%s3305_s17 + $0x4] sm:$0xf] %vm2307_vm1, %v2422_v31 }
 0x5ea   : > { %2437 = vst.msk [vmem:[%s3305_s17 + $0x4] sm:$0xf] %vm2321_vm2, %v2435_v26 }
 0x5ef   : > { %v2333_v32 = vpop.permute.xlu0 %2332 }
 0x5f0   : > { %v2448_v33 = vpop.permute.xlu1 %2447  ;;  %2336 = vst.msk [vmem:[%s3305_s17] sm:$0xf] %vm2335_vm3, %v2333_v32 }
 0x5f1   : > { %2450 = vst.msk [vmem:[%s3305_s17 + $0x4] sm:$0xf] %vm2335_vm3, %v2448_v33 }
 0x5f2   : > { %2463 = vst.msk [vmem:[%s3305_s17 + $0x4] sm:$0xf] %vm2349_vm4, %v2461_v34 }
 0x5f7   : > { %v2347_v35 = vpop.permute.xlu0 %2346 }
 0x5f8   : > { %v2478_v36 = vpop.permute.xlu1 %2477  ;;  %2350 = vst.msk [vmem:[%s3305_s17] sm:$0xf] %vm2349_vm4, %v2347_v35 }
 0x5f9   : > { %v2479_v38 = vrot.slane %v2478_v36, 4 }
 0x5fb   : > { %v2481_v39 = vsel %vm2480_vm5, %v2478_v36, %v2479_v38 }
 0x5fc   : > { %2483 = vst.msk [vmem:[%s3305_s17 + $0x4] sm:$0xf] %vm2363_vm10, %v2481_v39 }
 0x5ff   : > { %v2494_v43 = vpop.permute.xlu0 %2493 }
 0x600   : > { %v2361_v44 = vpop.permute.xlu1 %2360  ;;  %2496 = vst.msk [vmem:[%s3305_s17 + $0x4] sm:$0xf] %vm2384_vm12, %v2494_v43 }
 0x601   : > { %2364 = vst.msk [vmem:[%s3305_s17] sm:$0xf] %vm2363_vm10, %v2361_v44 }
 0x602   : > { %2385 = vst.msk [vmem:[%s3305_s17] sm:$0xf] %vm2384_vm12, %v2382_v45 }
 0x603 PF: > { %s18_s27 = sadd.s32 1, %s2766_s27  }
 0x604   : > { %p15_p4 = scmp.ge.s32.totalorder %s18_s27, 4  }
 0x606   :  { %17 = sbr.rel (!%p15_p4) target bundleno = 1 (0x1), region = 116 }

</bundles_post_ra>
